<compile_context>
chip_gen: v7x
topology: tpu7x:2x2x1
jax: 0.10.0
libtpu: 0.0.40
codegen_flags: <defaults>
</compile_context>

<pallas_src>
import jax
import jax.numpy as jnp
from jax.experimental import pallas as pl
from jax.experimental.pallas import tpu as pltpu

# ----------------------------- config -----------------------------------
IMG_H = IMG_W = 32          # small synthetic image (PyTorch uses 224)
PATCH = 16                  # dino_vitb16 patch / stride
NUM_PATCHES = (IMG_H // PATCH) * (IMG_W // PATCH)     # 4
PATCH_DIM = 3 * PATCH * PATCH                         # 768
EMBED_DIM = 128             # synthetic embed size (real dino_vitb16 cls: 768)
HIDDEN = 128                # MLP hidden_size
NORMALIZE_EMBEDS = False    # matches PerceptualModel(normalize_embeds=False)

DINO_MEAN = jnp.array([0.485, 0.456, 0.406], jnp.float32)
DINO_STD = jnp.array([0.229, 0.224, 0.225], jnp.float32)

_HIGHEST = jax.lax.Precision.HIGHEST   # used only OUTSIDE the kernel


# ----------------------------- kernel ------------------------------------
def perceptual_kernel(x_ref, w_ref, b_ref, out_ref):
    """Computes 1 - cosine_similarity(embed(img_a), embed(img_b)).

    x_ref : (2, PATCH_DIM) f32   pre-pooled raw patch means, one row per image
    w_ref : (PATCH_DIM + HIDDEN, 2*EMBED_DIM) f32 packed weights
              rows [0:768)   = [ Wp/std | (Wp/std)@W1 ]   (fused fc1 fold)
              rows [768:896) = [ W2     | 0            ]
    b_ref : (2, 2*EMBED_DIM) f32 packed biases
              row 0 = [ bp | bp@W1 + b1 ],  row 1 = [ b2 | 0 ]
    out_ref: (1, 128) f32        lane-dense slab; distance broadcast over lanes
    """
    x = x_ref[...]                                        # (2, 768) f32

    w_fused = w_ref[0:PATCH_DIM, :]                       # (768, 256)
    w2 = w_ref[PATCH_DIM:PATCH_DIM + HIDDEN, 0:EMBED_DIM] # (128, 128)
    bias_fused = b_ref[0:1, :]                            # (1, 256)
    b2 = b_ref[1:2, 0:EMBED_DIM]                          # (1, 128)

    # MXU pass 1: [cls | fc1 pre-activation] in one 256-wide matmul.
    # DINO normalization and fc1 are both folded into w_fused / bias_fused.
    ch = jnp.dot(x, w_fused, preferred_element_type=jnp.float32) + bias_fused
    cls = ch[:, 0:EMBED_DIM]                              # (2, 128)
    h = jnp.maximum(ch[:, EMBED_DIM:], 0.0)               # (2, 128) relu(fc1)

    # MXU pass 2: fc2 + bias + residual  ->  embedding
    e = jnp.dot(h, w2, preferred_element_type=jnp.float32) + b2 + cls  # (2,128)

    if NORMALIZE_EMBEDS:
        # normalize_embedding: divide by row norm, then subtract row mean
        e = e * jax.lax.rsqrt(jnp.sum(e * e, axis=1, keepdims=True))
        e = e - jnp.mean(e, axis=1, keepdims=True)

    ea = e[0:1, :]
    eb = e[1:2, :]

    # Fused epilogue: one cross-lane reduction for |a|^2, |b|^2 and a.b
    stacked = jnp.concatenate([ea * ea, eb * eb, ea * eb], axis=0)  # (3, 128)
    sums = jnp.sum(stacked, axis=1, keepdims=True)                  # (3, 1)

    eps = 1e-8                                   # torch cosine_similarity eps
    na2 = jnp.maximum(sums[0:1, :], eps * eps)
    nb2 = jnp.maximum(sums[1:2, :], eps * eps)
    dot_ab = sums[2:3, :]
    cos = dot_ab * jax.lax.rsqrt(na2) * jax.lax.rsqrt(nb2)          # (1, 1)

    out_ref[...] = jnp.broadcast_to(1.0 - cos, (1, 128))            # lane-dense


# ----------------------------- wrapper ------------------------------------
def _pool_patches(img):
    """img: (1, 3, H, W) raw pixels in [0,1] -> (1, PATCH_DIM) mean patch.

    Mean over patch tokens commutes with the linear patch embedding, so we
    pool raw pixels here (exact). Column order is (c, ph, pw), matching wp.
    No mean/std normalization here: it is folded into the kernel weights.
    """
    x = img[0].reshape(3, IMG_H // PATCH, PATCH, IMG_W // PATCH, PATCH)
    x = jnp.mean(x, axis=(1, 3))                         # (3, P, P)
    return x.reshape(1, PATCH_DIM).astype(jnp.float32)


def prepare_kernel_params(wp, w1, b1, w2, b2):
    """Fold DINO normalization + fc1 into packed f32 weight / bias buffers.

    Called ONCE outside the hot loop.
    """
    mean_vec = jnp.repeat(DINO_MEAN, PATCH * PATCH)           # (768,)
    std_vec = jnp.repeat(DINO_STD, PATCH * PATCH)             # (768,)
    wp_s = wp / std_vec[:, None]                              # (768, D)
    bp = -jnp.dot((mean_vec / std_vec)[None, :], wp, precision=_HIGHEST)  # (1,D)

    wp1 = jnp.dot(wp_s, w1, precision=_HIGHEST)               # (768, H) fc1 fold
    b1p = jnp.dot(bp, w1, precision=_HIGHEST) + b1            # (1, H)

    w_all = jnp.concatenate(
        [jnp.concatenate([wp_s, wp1], axis=1),                          # (768, 256)
         jnp.concatenate([w2, jnp.zeros((HIDDEN, EMBED_DIM), jnp.float32)],
                         axis=1)],                                      # (128, 256)
        axis=0).astype(jnp.float32)                                     # (896, 256)
    b_all = jnp.concatenate(
        [jnp.concatenate([bp, b1p], axis=1),                            # (1, 256)
         jnp.concatenate([b2, jnp.zeros((1, HIDDEN), jnp.float32)], axis=1)],
        axis=0).astype(jnp.float32)                                     # (2, 256)
    return w_all, b_all


def _distance_impl(img_a, img_b, w_all, b_all):
    # Both images stacked into ONE (2, 768) operand: one pass, one weight load.
    x = jnp.concatenate([_pool_patches(img_a), _pool_patches(img_b)], axis=0)

    vmem = pl.BlockSpec(memory_space=pltpu.MemorySpace.VMEM)
    out = pl.pallas_call(
        perceptual_kernel,
        out_shape=jax.ShapeDtypeStruct((1, 128), jnp.float32),
        in_specs=[vmem, vmem, vmem],
        out_specs=vmem,
    )(x, w_all, b_all)
    return out[0, 0]                         # scalar distance


# Everything (pooling, concat, kernel, final slice) under a single jit.
perceptual_distance = jax.jit(_distance_impl)


# ----------------------------- reference (f32 spec) ------------------------
def _reference_distance(img_a, img_b, params):
    wp, w1, b1, w2, b2 = params

    def embed(img):
        x = (img - DINO_MEAN[None, :, None, None]) / DINO_STD[None, :, None, None]
        x = x[0].reshape(3, IMG_H // PATCH, PATCH, IMG_W // PATCH, PATCH)
        x = jnp.transpose(x, (1, 3, 0, 2, 4)).reshape(NUM_PATCHES, PATCH_DIM)
        cls = jnp.mean(jnp.dot(x, wp, precision=_HIGHEST), axis=0, keepdims=True)
        h = jnp.maximum(jnp.dot(cls, w1, precision=_HIGHEST) + b1, 0.0)
        e = jnp.dot(h, w2, precision=_HIGHEST) + b2 + cls
        if NORMALIZE_EMBEDS:
            e = e / jnp.linalg.norm(e, axis=1, keepdims=True)
            e = e - jnp.mean(e, axis=1, keepdims=True)
        return e[0]

    ea, eb = embed(img_a), embed(img_b)
    eps = 1e-8
    cos = jnp.dot(ea, eb) / (jnp.maximum(jnp.linalg.norm(ea), eps) *
                             jnp.maximum(jnp.linalg.norm(eb), eps))
    return 1.0 - cos


# ----------------------------- main ----------------------------------------
if __name__ == "__main__":
    key = jax.random.PRNGKey(0)
    k_a, k_b, k_wp, k_w1, k_b1, k_w2, k_b2 = jax.random.split(key, 7)

    img_a = jax.random.uniform(k_a, (1, 3, IMG_H, IMG_W), jnp.float32)
    img_b = jax.random.uniform(k_b, (1, 3, IMG_H, IMG_W), jnp.float32)

    # deterministic synthetic parameters (f32 "master" weights)
    wp = jax.random.normal(k_wp, (PATCH_DIM, EMBED_DIM), jnp.float32) * 0.02
    w1 = jax.random.normal(k_w1, (EMBED_DIM, HIDDEN), jnp.float32) * 0.05
    b1 = jax.random.normal(k_b1, (1, HIDDEN), jnp.float32) * 0.01
    w2 = jax.random.normal(k_w2, (HIDDEN, EMBED_DIM), jnp.float32) * 0.05
    b2 = jax.random.normal(k_b2, (1, EMBED_DIM), jnp.float32) * 0.01

    # one-time parameter preparation, outside the jitted hot path
    w_all, b_all = prepare_kernel_params(wp, w1, b1, w2, b2)

    dist = jax.block_until_ready(perceptual_distance(img_a, img_b, w_all, b_all))
    ref = _reference_distance(img_a, img_b, (wp, w1, b1, w2, b2))

    assert dist.shape == ()
    assert jnp.allclose(dist, ref, atol=5e-3, rtol=5e-3), (dist, ref)
    print("KERNEL_OK")
</pallas_src>

<mosaic_0001>
module attributes {stable_mosaic.version = 11 : i64} {
  func.func @perceptual_kernel(%arg0: memref<2x768xf32, #tpu.memory_space<vmem>>, %arg1: memref<896x256xf32, #tpu.memory_space<vmem>>, %arg2: memref<2x256xf32, #tpu.memory_space<vmem>>, %arg3: memref<1x128xf32, #tpu.memory_space<vmem>>) attributes {dimension_semantics = [], scalar_prefetch = 0 : i64, scratch_operands = 0 : i64, tpu.core_type = #tpu.core_type<tc>} {
    %c0 = arith.constant 0 : index
    %c0_0 = arith.constant 0 : index
    %0 = vector.load %arg0[%c0, %c0_0] : memref<2x768xf32, #tpu.memory_space<vmem>>, vector<2x768xf32>
    %c0_1 = arith.constant 0 : index
    %c0_2 = arith.constant 0 : index
    %1 = vector.load %arg1[%c0_1, %c0_2] : memref<896x256xf32, #tpu.memory_space<vmem>>, vector<768x256xf32>
    %c768 = arith.constant 768 : index
    %c0_3 = arith.constant 0 : index
    %2 = vector.load %arg1[%c768, %c0_3] : memref<896x256xf32, #tpu.memory_space<vmem>>, vector<128x128xf32>
    %c0_4 = arith.constant 0 : index
    %c0_5 = arith.constant 0 : index
    %3 = vector.load %arg2[%c0_4, %c0_5] : memref<2x256xf32, #tpu.memory_space<vmem>>, vector<1x256xf32>
    %c1 = arith.constant 1 : index
    %c0_6 = arith.constant 0 : index
    %4 = vector.load %arg2[%c1, %c0_6] : memref<2x256xf32, #tpu.memory_space<vmem>>, vector<1x128xf32>
    %cst = arith.constant dense<0.000000e+00> : vector<2x256xf32>
    %5 = tpu.matmul %0, %1, %cst {dimension_numbers = #tpu.dot_dimension_numbers<[1], [0], [0], [1], [0, 0, 1, 1], [], []>} : vector<2x768xf32>, vector<768x256xf32>, vector<2x256xf32> -> vector<2x256xf32>
    %6 = vector.broadcast %3 : vector<1x256xf32> to vector<2x256xf32>
    %7 = arith.addf %5, %6 : vector<2x256xf32>
    %8 = vector.extract_strided_slice %7 {offsets = [0, 0], sizes = [2, 128], strides = [1, 1]} : vector<2x256xf32> to vector<2x128xf32>
    %9 = vector.extract_strided_slice %7 {offsets = [0, 128], sizes = [2, 128], strides = [1, 1]} : vector<2x256xf32> to vector<2x128xf32>
    %cst_7 = arith.constant 0.000000e+00 : f32
    %10 = vector.broadcast %cst_7 : f32 to vector<2x128xf32>
    %11 = arith.maximumf %9, %10 : vector<2x128xf32>
    %cst_8 = arith.constant dense<0.000000e+00> : vector<2x128xf32>
    %12 = tpu.matmul %11, %2, %cst_8 {dimension_numbers = #tpu.dot_dimension_numbers<[1], [0], [0], [1], [0, 0, 1, 1], [], []>} : vector<2x128xf32>, vector<128x128xf32>, vector<2x128xf32> -> vector<2x128xf32>
    %13 = vector.broadcast %4 : vector<1x128xf32> to vector<2x128xf32>
    %14 = arith.addf %12, %13 : vector<2x128xf32>
    %15 = arith.addf %14, %8 : vector<2x128xf32>
    %16 = vector.extract_strided_slice %15 {offsets = [0, 0], sizes = [1, 128], strides = [1, 1]} : vector<2x128xf32> to vector<1x128xf32>
    %17 = vector.extract_strided_slice %15 {offsets = [1, 0], sizes = [1, 128], strides = [1, 1]} : vector<2x128xf32> to vector<1x128xf32>
    %18 = arith.mulf %16, %16 : vector<1x128xf32>
    %19 = arith.mulf %17, %17 : vector<1x128xf32>
    %20 = arith.mulf %16, %17 : vector<1x128xf32>
    %21 = tpu.concatenate %18, %19, %20 in 0 : vector<1x128xf32>, vector<1x128xf32>, vector<1x128xf32> -> vector<3x128xf32>
    %cst_9 = arith.constant dense<0.000000e+00> : vector<3xf32>
    %22 = vector.multi_reduction <add>, %21, %cst_9 [1] : vector<3x128xf32> to vector<3xf32>
    %23 = vector.shape_cast %22 : vector<3xf32> to vector<3x1xf32>
    %24 = vector.extract_strided_slice %23 {offsets = [0, 0], sizes = [1, 1], strides = [1, 1]} : vector<3x1xf32> to vector<1x1xf32>
    %cst_10 = arith.constant 1.000000e-16 : f32
    %25 = vector.broadcast %cst_10 : f32 to vector<1x1xf32>
    %26 = arith.maximumf %24, %25 : vector<1x1xf32>
    %27 = vector.extract_strided_slice %23 {offsets = [1, 0], sizes = [1, 1], strides = [1, 1]} : vector<3x1xf32> to vector<1x1xf32>
    %cst_11 = arith.constant 1.000000e-16 : f32
    %28 = vector.broadcast %cst_11 : f32 to vector<1x1xf32>
    %29 = arith.maximumf %27, %28 : vector<1x1xf32>
    %30 = vector.extract_strided_slice %23 {offsets = [2, 0], sizes = [1, 1], strides = [1, 1]} : vector<3x1xf32> to vector<1x1xf32>
    %31 = math.rsqrt %26 : vector<1x1xf32>
    %32 = arith.mulf %30, %31 : vector<1x1xf32>
    %33 = math.rsqrt %29 : vector<1x1xf32>
    %34 = arith.mulf %32, %33 : vector<1x1xf32>
    %cst_12 = arith.constant 1.000000e+00 : f32
    %35 = vector.broadcast %cst_12 : f32 to vector<1x1xf32>
    %36 = arith.subf %35, %34 : vector<1x1xf32>
    %37 = vector.shape_cast %36 : vector<1x1xf32> to vector<1x1xf32>
    %38 = vector.broadcast %37 : vector<1x1xf32> to vector<1x128xf32>
    %c0_13 = arith.constant 0 : index
    %c0_14 = arith.constant 0 : index
    %39 = vector.load %arg3[%c0_13, %c0_14] : memref<1x128xf32, #tpu.memory_space<vmem>>, vector<1x128xf32>
    tpu.vector_store %arg3[%c0_13, %c0_14], %38 {strides = array<i32>} : memref<1x128xf32, #tpu.memory_space<vmem>>, vector<1x128xf32>,
    return
  }
}

</mosaic_0001>

<bundles_post_ra>
// kernel: squeeze.3
= control target key start
LH: loop header
LB: loop body
LE: loop exit
PB: predicated region body
PF: predicated region fallthrough
CT: control target
= control target key end

     0   :  { %2 = vsyncpa [#allocation1], 0  ;;  %s991_s6 = smov [#allocation0]   ;;  %s1363_s0 = inlined_call_operand.hbm [shape: f32[1,3,32,32], index: 0, kind: input, shape index: {}]   ;;  %s1364_s1 = inlined_call_operand.vmem [shape: f32[3,2,16,2,16], index: 1, kind: output, shape index: {}]  }
   0x1   :  { %s7_s7 = sshll.u32 %s991_s6, 4  ;;  %s967_s10 = scalar_lea.hbm %s1363_s0, 1536  ;;  %s8_s7 = int_to_ptr.vmem [resolvable:$true] %s7_s7 }
   0x2   :  { %p968_p0 = scmp.ne.s32.totalorder %s1363_s0, %s967_s10  ;;  %p971_p1 = scmp.lt.u32.totalorder %s967_s10, %s1363_s0 }
   0x4   :  { %p973_p2 = pnand %p971_p1, %p968_p0 }
   0x6   :  { %976 = shalt.err (!%p973_p2)
}
   0x7   :  { %s977_s15 = scalar_lea.vmem %s8_s7, 1536  ;;  %p982_p4 = scmp.lt.s32.totalorder %s8_s7, %s8_s7 }
   0x8   :  { %p978_p3 = scmp.ne.s32.totalorder %s8_s7, %s977_s15  ;;  %p983_p5 = scmp.lt.s32.totalorder %s977_s15, %s977_s15 }
   0xa   :  { %p984_p6 = por %p983_p5, %p982_p4 }
   0xc   :  { %p985_p7 = pnand %p984_p6, %p978_p3 }
   0xe   :  { %988 = shalt.err (!%p985_p7)
}
   0xf   :  { %10 = dma.hbm_to_vmem [thread:$0]  %s1363_s0, 1536, %s8_s7, [#allocation1]  }
  0x10   :  { %989 = dma.done.wait [#allocation1], 1536  }
  0x11   :  { %990 = vsyncadd [#allocation1], 4294965760  ;;  %vm13_vm0 = vcmask 130048   ;;  %v111_v0 = vld [vmem:[#allocation0 + $0x10] sm:$0xff]   ;;  %v93_v1 = vld [vmem:[#allocation0] sm:$0xff]   ;;  %s992_s0 = smov 112  }
  0x12   :  { %v120_v2 = vld [vmem:[#allocation0 + $0x18] sm:$0xff]   ;;  %112 = vrot.lane.b32.xlu1 %v111_v0, %s992_s0  ;;  %94 = vrot.lane.b32.xlu0 %v93_v1, %s992_s0  ;;  %v102_v3 = vld [vmem:[#allocation0 + $0x8] sm:$0xff]   ;;  %v129_v5 = vld [vmem:[#allocation0 + $0x20] sm:$0xff]   ;;  %27 = vst.msk [vmem:[#allocation2 + $0x80] ss:$8 sm:$0xf] %vm13_vm0, %v111_v0  }
  0x13   :  { %v138_v4 = vld [vmem:[#allocation0 + $0x28] sm:$0xff]   ;;  %29 = vst.msk [vmem:[#allocation2 + $0x80] ss:$8 sm:$0xf0] %vm13_vm0, %v111_v0   ;;  %v156_v6 = vld [vmem:[#allocation0 + $0x38] sm:$0xff]   ;;  %v147_v7 = vld [vmem:[#allocation0 + $0x30] sm:$0xff]  }
  0x14   :  { %14 = vst.msk [vmem:[#allocation2] ss:$8 sm:$0xf] %vm13_vm0, %v93_v1   ;;  %15 = vst.msk [vmem:[#allocation2] ss:$8 sm:$0xf0] %vm13_vm0, %v93_v1  }
  0x15   :  { %34 = vst.msk [vmem:[#allocation2 + $0xc0] ss:$8 sm:$0xf] %vm13_vm0, %v120_v2   ;;  %36 = vst.msk [vmem:[#allocation2 + $0xc0] ss:$8 sm:$0xf0] %vm13_vm0, %v120_v2  }
  0x16   :  { %v174_v8 = vld [vmem:[#allocation0 + $0x48] sm:$0xff]   ;;  %20 = vst.msk [vmem:[#allocation2 + $0x40] ss:$8 sm:$0xf] %vm13_vm0, %v102_v3   ;;  %v165_v9 = vld [vmem:[#allocation0 + $0x40] sm:$0xff]   ;;  %v192_v10 = vld [vmem:[#allocation0 + $0x58] sm:$0xff]   ;;  %121 = vrot.lane.b32.xlu1 %v120_v2, %s992_s0  ;;  %103 = vrot.lane.b32.xlu0 %v102_v3, %s992_s0 }
  0x17   :  { %22 = vst.msk [vmem:[#allocation2 + $0x40] ss:$8 sm:$0xf0] %vm13_vm0, %v102_v3   ;;  %48 = vst.msk [vmem:[#allocation2 + $0x140] ss:$8 sm:$0xf] %vm13_vm0, %v138_v4  }
  0x18   :  { %50 = vst.msk [vmem:[#allocation2 + $0x140] ss:$8 sm:$0xf0] %vm13_vm0, %v138_v4   ;;  %41 = vst.msk [vmem:[#allocation2 + $0x100] ss:$8 sm:$0xf] %vm13_vm0, %v129_v5  }
  0x19   :  { %43 = vst.msk [vmem:[#allocation2 + $0x100] ss:$8 sm:$0xf0] %vm13_vm0, %v129_v5   ;;  %v183_v11 = vld [vmem:[#allocation0 + $0x50] sm:$0xff]  }
  0x1a   :  { %62 = vst.msk [vmem:[#allocation2 + $0x1c0] ss:$8 sm:$0xf] %vm13_vm0, %v156_v6   ;;  %64 = vst.msk [vmem:[#allocation2 + $0x1c0] ss:$8 sm:$0xf0] %vm13_vm0, %v156_v6   ;;  %139 = vrot.lane.b32.xlu1 %v138_v4, %s992_s0  ;;  %130 = vrot.lane.b32.xlu0 %v129_v5, %s992_s0 }
  0x1b   :  { %55 = vst.msk [vmem:[#allocation2 + $0x180] ss:$8 sm:$0xf] %vm13_vm0, %v147_v7   ;;  %57 = vst.msk [vmem:[#allocation2 + $0x180] ss:$8 sm:$0xf0] %vm13_vm0, %v147_v7  }
  0x1c   :  { %76 = vst.msk [vmem:[#allocation2 + $0x240] ss:$8 sm:$0xf] %vm13_vm0, %v174_v8   ;;  %78 = vst.msk [vmem:[#allocation2 + $0x240] ss:$8 sm:$0xf0] %vm13_vm0, %v174_v8  }
  0x1d   :  { %69 = vst.msk [vmem:[#allocation2 + $0x200] ss:$8 sm:$0xf] %vm13_vm0, %v165_v9   ;;  %71 = vst.msk [vmem:[#allocation2 + $0x200] ss:$8 sm:$0xf0] %vm13_vm0, %v165_v9  }
  0x1e   :  { %90 = vst.msk [vmem:[#allocation2 + $0x2c0] ss:$8 sm:$0xf] %vm13_vm0, %v192_v10   ;;  %92 = vst.msk [vmem:[#allocation2 + $0x2c0] ss:$8 sm:$0xf0] %vm13_vm0, %v192_v10   ;;  %157 = vrot.lane.b32.xlu1 %v156_v6, %s992_s0  ;;  %148 = vrot.lane.b32.xlu0 %v147_v7, %s992_s0 }
  0x1f   :  { %83 = vst.msk [vmem:[#allocation2 + $0x280] ss:$8 sm:$0xf] %vm13_vm0, %v183_v11   ;;  %85 = vst.msk [vmem:[#allocation2 + $0x280] ss:$8 sm:$0xf0] %vm13_vm0, %v183_v11  }
  0x22   :  { %175 = vrot.lane.b32.xlu1 %v174_v8, %s992_s0  ;;  %166 = vrot.lane.b32.xlu0 %v165_v9, %s992_s0 }
  0x26   :  { %193 = vrot.lane.b32.xlu1 %v192_v10, %s992_s0  ;;  %184 = vrot.lane.b32.xlu0 %v183_v11, %s992_s0 }
  0x84   :  { %v113_v12 = vpop.permute.xlu1 %112   ;;  %v95_v13 = vpop.permute.xlu0 %94  }
  0x85   :  { %116 = vst.msk [vmem:[#allocation2 + $0x81] ss:$8 sm:$0xf] %vm13_vm0, %v113_v12   ;;  %118 = vst.msk [vmem:[#allocation2 + $0x81] ss:$8 sm:$0xf0] %vm13_vm0, %v113_v12  }
  0x86   :  { %98 = vst.msk [vmem:[#allocation2 + $0x1] ss:$8 sm:$0xf] %vm13_vm0, %v95_v13   ;;  %100 = vst.msk [vmem:[#allocation2 + $0x1] ss:$8 sm:$0xf0] %vm13_vm0, %v95_v13  }
  0x88   :  { %v122_v14 = vpop.permute.xlu1 %121   ;;  %v104_v15 = vpop.permute.xlu0 %103  }
  0x89   :  { %125 = vst.msk [vmem:[#allocation2 + $0xc1] ss:$8 sm:$0xf] %vm13_vm0, %v122_v14   ;;  %127 = vst.msk [vmem:[#allocation2 + $0xc1] ss:$8 sm:$0xf0] %vm13_vm0, %v122_v14  }
  0x8a   :  { %107 = vst.msk [vmem:[#allocation2 + $0x41] ss:$8 sm:$0xf] %vm13_vm0, %v104_v15   ;;  %109 = vst.msk [vmem:[#allocation2 + $0x41] ss:$8 sm:$0xf0] %vm13_vm0, %v104_v15  }
  0x8c   :  { %v296_v16 = vld [vmem:[#allocation2 + $0x80] sm:$0x3]  ;;  %v302_v17 = vld [vmem:[#allocation2 + $0x88] sm:$0x3]  ;;  %v308_v18 = vld [vmem:[#allocation2 + $0x90] sm:$0x3]  ;;  %v140_v19 = vpop.permute.xlu1 %139   ;;  %v131_v20 = vpop.permute.xlu0 %130  }
  0x8d   :  { %885 = vst [vmem:[%s1364_s1 + $0x20] sm:$0x3] %v296_v16  ;;  %886 = vst [vmem:[%s1364_s1 + $0x22] sm:$0x3] %v302_v17  ;;  %v314_v21 = vld [vmem:[#allocation2 + $0x98] sm:$0x3] }
  0x8e   :  { %887 = vst [vmem:[%s1364_s1 + $0x24] sm:$0x3] %v308_v18  ;;  %v320_v22 = vld [vmem:[#allocation2 + $0xa0] sm:$0x3]  ;;  %v326_v23 = vld [vmem:[#allocation2 + $0xa8] sm:$0x3] }
  0x8f   :  { %143 = vst.msk [vmem:[#allocation2 + $0x141] ss:$8 sm:$0xf] %vm13_vm0, %v140_v19   ;;  %145 = vst.msk [vmem:[#allocation2 + $0x141] ss:$8 sm:$0xf0] %vm13_vm0, %v140_v19  }
  0x90   :  { %134 = vst.msk [vmem:[#allocation2 + $0x101] ss:$8 sm:$0xf] %vm13_vm0, %v131_v20   ;;  %136 = vst.msk [vmem:[#allocation2 + $0x101] ss:$8 sm:$0xf0] %vm13_vm0, %v131_v20   ;;  %v158_v33 = vpop.permute.xlu1 %157   ;;  %v149_v34 = vpop.permute.xlu0 %148  }
  0x91   :  { %888 = vst [vmem:[%s1364_s1 + $0x26] sm:$0x3] %v314_v21  ;;  %889 = vst [vmem:[%s1364_s1 + $0x28] sm:$0x3] %v320_v22  ;;  %v332_v24 = vld [vmem:[#allocation2 + $0xb0] sm:$0x3] }
  0x92   :  { %890 = vst [vmem:[%s1364_s1 + $0x2a] sm:$0x3] %v326_v23  ;;  %v338_v25 = vld [vmem:[#allocation2 + $0xb8] sm:$0x3]  ;;  %v203_v26 = vld [vmem:[#allocation2] sm:$0x3] }
  0x93   :  { %891 = vst [vmem:[%s1364_s1 + $0x2c] sm:$0x3] %v332_v24  ;;  %892 = vst [vmem:[%s1364_s1 + $0x2e] sm:$0x3] %v338_v25  ;;  %v207_v27 = vld [vmem:[#allocation2 + $0x8] sm:$0x3] }
  0x94   :  { %205 = vst [vmem:[%s1364_s1] sm:$0x3] %v203_v26  ;;  %v212_v28 = vld [vmem:[#allocation2 + $0x10] sm:$0x3]  ;;  %v218_v29 = vld [vmem:[#allocation2 + $0x18] sm:$0x3]  ;;  %v176_v47 = vpop.permute.xlu1 %175   ;;  %v167_v48 = vpop.permute.xlu0 %166  }
  0x95   :  { %870 = vst [vmem:[%s1364_s1 + $0x2] sm:$0x3] %v207_v27  ;;  %871 = vst [vmem:[%s1364_s1 + $0x4] sm:$0x3] %v212_v28  ;;  %v224_v30 = vld [vmem:[#allocation2 + $0x20] sm:$0x3] }
  0x96   :  { %872 = vst [vmem:[%s1364_s1 + $0x6] sm:$0x3] %v218_v29  ;;  %v230_v31 = vld [vmem:[#allocation2 + $0x28] sm:$0x3]  ;;  %v236_v32 = vld [vmem:[#allocation2 + $0x30] sm:$0x3] }
  0x97   :  { %873 = vst [vmem:[%s1364_s1 + $0x8] sm:$0x3] %v224_v30  ;;  %874 = vst [vmem:[%s1364_s1 + $0xa] sm:$0x3] %v230_v31  ;;  %v242_v35 = vld [vmem:[#allocation2 + $0x38] sm:$0x3] }
  0x98   :  { %875 = vst [vmem:[%s1364_s1 + $0xc] sm:$0x3] %v236_v32  ;;  %v344_v36 = vld [vmem:[#allocation2 + $0xc0] sm:$0x3]  ;;  %v350_v37 = vld [vmem:[#allocation2 + $0xc8] sm:$0x3]  ;;  %v194_v61 = vpop.permute.xlu1 %193   ;;  %v185_v62 = vpop.permute.xlu0 %184  }
  0x99   :  { %161 = vst.msk [vmem:[#allocation2 + $0x1c1] ss:$8 sm:$0xf] %vm13_vm0, %v158_v33   ;;  %163 = vst.msk [vmem:[#allocation2 + $0x1c1] ss:$8 sm:$0xf0] %vm13_vm0, %v158_v33  }
  0x9a   :  { %152 = vst.msk [vmem:[#allocation2 + $0x181] ss:$8 sm:$0xf] %vm13_vm0, %v149_v34   ;;  %154 = vst.msk [vmem:[#allocation2 + $0x181] ss:$8 sm:$0xf0] %vm13_vm0, %v149_v34  }
  0x9b   :  { %876 = vst [vmem:[%s1364_s1 + $0xe] sm:$0x3] %v242_v35  ;;  %893 = vst [vmem:[%s1364_s1 + $0x30] sm:$0x3] %v344_v36  ;;  %v356_v38 = vld [vmem:[#allocation2 + $0xd0] sm:$0x3] }
  0x9c   :  { %894 = vst [vmem:[%s1364_s1 + $0x32] sm:$0x3] %v350_v37  ;;  %v362_v39 = vld [vmem:[#allocation2 + $0xd8] sm:$0x3]  ;;  %v368_v40 = vld [vmem:[#allocation2 + $0xe0] sm:$0x3] }
  0x9d   :  { %895 = vst [vmem:[%s1364_s1 + $0x34] sm:$0x3] %v356_v38  ;;  %896 = vst [vmem:[%s1364_s1 + $0x36] sm:$0x3] %v362_v39  ;;  %v374_v41 = vld [vmem:[#allocation2 + $0xe8] sm:$0x3] }
  0x9e   :  { %897 = vst [vmem:[%s1364_s1 + $0x38] sm:$0x3] %v368_v40  ;;  %v380_v42 = vld [vmem:[#allocation2 + $0xf0] sm:$0x3]  ;;  %v386_v43 = vld [vmem:[#allocation2 + $0xf8] sm:$0x3] }
  0x9f   :  { %898 = vst [vmem:[%s1364_s1 + $0x3a] sm:$0x3] %v374_v41  ;;  %899 = vst [vmem:[%s1364_s1 + $0x3c] sm:$0x3] %v380_v42  ;;  %v248_v44 = vld [vmem:[#allocation2 + $0x40] sm:$0x3] }
  0xa0   :  { %900 = vst [vmem:[%s1364_s1 + $0x3e] sm:$0x3] %v386_v43  ;;  %v254_v45 = vld [vmem:[#allocation2 + $0x48] sm:$0x3]  ;;  %v260_v46 = vld [vmem:[#allocation2 + $0x50] sm:$0x3] }
  0xa1   :  { %877 = vst [vmem:[%s1364_s1 + $0x10] sm:$0x3] %v248_v44  ;;  %878 = vst [vmem:[%s1364_s1 + $0x12] sm:$0x3] %v254_v45  ;;  %v266_v49 = vld [vmem:[#allocation2 + $0x58] sm:$0x3] }
  0xa2   :  { %879 = vst [vmem:[%s1364_s1 + $0x14] sm:$0x3] %v260_v46  ;;  %v272_v50 = vld [vmem:[#allocation2 + $0x60] sm:$0x3]  ;;  %v278_v51 = vld [vmem:[#allocation2 + $0x68] sm:$0x3] }
  0xa3   :  { %179 = vst.msk [vmem:[#allocation2 + $0x241] ss:$8 sm:$0xf] %vm13_vm0, %v176_v47   ;;  %181 = vst.msk [vmem:[#allocation2 + $0x241] ss:$8 sm:$0xf0] %vm13_vm0, %v176_v47  }
  0xa4   :  { %170 = vst.msk [vmem:[#allocation2 + $0x201] ss:$8 sm:$0xf] %vm13_vm0, %v167_v48   ;;  %172 = vst.msk [vmem:[#allocation2 + $0x201] ss:$8 sm:$0xf0] %vm13_vm0, %v167_v48  }
  0xa5   :  { %880 = vst [vmem:[%s1364_s1 + $0x16] sm:$0x3] %v266_v49  ;;  %881 = vst [vmem:[%s1364_s1 + $0x18] sm:$0x3] %v272_v50  ;;  %v284_v52 = vld [vmem:[#allocation2 + $0x70] sm:$0x3] }
  0xa6   :  { %882 = vst [vmem:[%s1364_s1 + $0x1a] sm:$0x3] %v278_v51  ;;  %v290_v53 = vld [vmem:[#allocation2 + $0x78] sm:$0x3]  ;;  %v440_v54 = vld [vmem:[#allocation2 + $0x140] sm:$0x3] }
  0xa7   :  { %883 = vst [vmem:[%s1364_s1 + $0x1c] sm:$0x3] %v284_v52  ;;  %884 = vst [vmem:[%s1364_s1 + $0x1e] sm:$0x3] %v290_v53  ;;  %v446_v55 = vld [vmem:[#allocation2 + $0x148] sm:$0x3] }
  0xa8   :  { %909 = vst [vmem:[%s1364_s1 + $0x50] sm:$0x3] %v440_v54  ;;  %v452_v56 = vld [vmem:[#allocation2 + $0x150] sm:$0x3]  ;;  %v458_v57 = vld [vmem:[#allocation2 + $0x158] sm:$0x3] }
  0xa9   :  { %910 = vst [vmem:[%s1364_s1 + $0x52] sm:$0x3] %v446_v55  ;;  %911 = vst [vmem:[%s1364_s1 + $0x54] sm:$0x3] %v452_v56  ;;  %v464_v58 = vld [vmem:[#allocation2 + $0x160] sm:$0x3] }
  0xaa   :  { %912 = vst [vmem:[%s1364_s1 + $0x56] sm:$0x3] %v458_v57  ;;  %v470_v59 = vld [vmem:[#allocation2 + $0x168] sm:$0x3]  ;;  %v476_v60 = vld [vmem:[#allocation2 + $0x170] sm:$0x3] }
  0xab   :  { %913 = vst [vmem:[%s1364_s1 + $0x58] sm:$0x3] %v464_v58  ;;  %914 = vst [vmem:[%s1364_s1 + $0x5a] sm:$0x3] %v470_v59  ;;  %v482_v63 = vld [vmem:[#allocation2 + $0x178] sm:$0x3] }
  0xac   :  { %915 = vst [vmem:[%s1364_s1 + $0x5c] sm:$0x3] %v476_v60  ;;  %v392_v0 = vld [vmem:[#allocation2 + $0x100] sm:$0x3]  ;;  %v398_v1 = vld [vmem:[#allocation2 + $0x108] sm:$0x3] }
  0xad   :  { %197 = vst.msk [vmem:[#allocation2 + $0x2c1] ss:$8 sm:$0xf] %vm13_vm0, %v194_v61   ;;  %199 = vst.msk [vmem:[#allocation2 + $0x2c1] ss:$8 sm:$0xf0] %vm13_vm0, %v194_v61  }
  0xae   :  { %188 = vst.msk [vmem:[#allocation2 + $0x281] ss:$8 sm:$0xf] %vm13_vm0, %v185_v62   ;;  %190 = vst.msk [vmem:[#allocation2 + $0x281] ss:$8 sm:$0xf0] %vm13_vm0, %v185_v62  }
  0xaf   :  { %916 = vst [vmem:[%s1364_s1 + $0x5e] sm:$0x3] %v482_v63  ;;  %901 = vst [vmem:[%s1364_s1 + $0x40] sm:$0x3] %v392_v0  ;;  %v404_v2 = vld [vmem:[#allocation2 + $0x110] sm:$0x3] }
  0xb0   :  { %902 = vst [vmem:[%s1364_s1 + $0x42] sm:$0x3] %v398_v1  ;;  %v410_v3 = vld [vmem:[#allocation2 + $0x118] sm:$0x3]  ;;  %v416_v4 = vld [vmem:[#allocation2 + $0x120] sm:$0x3] }
  0xb1   :  { %903 = vst [vmem:[%s1364_s1 + $0x44] sm:$0x3] %v404_v2  ;;  %904 = vst [vmem:[%s1364_s1 + $0x46] sm:$0x3] %v410_v3  ;;  %v422_v5 = vld [vmem:[#allocation2 + $0x128] sm:$0x3] }
  0xb2   :  { %905 = vst [vmem:[%s1364_s1 + $0x48] sm:$0x3] %v416_v4  ;;  %v428_v6 = vld [vmem:[#allocation2 + $0x130] sm:$0x3]  ;;  %v434_v7 = vld [vmem:[#allocation2 + $0x138] sm:$0x3] }
  0xb3   :  { %906 = vst [vmem:[%s1364_s1 + $0x4a] sm:$0x3] %v422_v5  ;;  %907 = vst [vmem:[%s1364_s1 + $0x4c] sm:$0x3] %v428_v6  ;;  %v536_v8 = vld [vmem:[#allocation2 + $0x1c0] sm:$0x3] }
  0xb4   :  { %908 = vst [vmem:[%s1364_s1 + $0x4e] sm:$0x3] %v434_v7  ;;  %v542_v9 = vld [vmem:[#allocation2 + $0x1c8] sm:$0x3]  ;;  %v548_v10 = vld [vmem:[#allocation2 + $0x1d0] sm:$0x3] }
  0xb5   :  { %925 = vst [vmem:[%s1364_s1 + $0x70] sm:$0x3] %v536_v8  ;;  %926 = vst [vmem:[%s1364_s1 + $0x72] sm:$0x3] %v542_v9  ;;  %v554_v11 = vld [vmem:[#allocation2 + $0x1d8] sm:$0x3] }
  0xb6   :  { %927 = vst [vmem:[%s1364_s1 + $0x74] sm:$0x3] %v548_v10  ;;  %v560_v12 = vld [vmem:[#allocation2 + $0x1e0] sm:$0x3]  ;;  %v566_v13 = vld [vmem:[#allocation2 + $0x1e8] sm:$0x3] }
  0xb7   :  { %928 = vst [vmem:[%s1364_s1 + $0x76] sm:$0x3] %v554_v11  ;;  %929 = vst [vmem:[%s1364_s1 + $0x78] sm:$0x3] %v560_v12  ;;  %v572_v14 = vld [vmem:[#allocation2 + $0x1f0] sm:$0x3] }
  0xb8   :  { %930 = vst [vmem:[%s1364_s1 + $0x7a] sm:$0x3] %v566_v13  ;;  %v578_v15 = vld [vmem:[#allocation2 + $0x1f8] sm:$0x3]  ;;  %v488_v16 = vld [vmem:[#allocation2 + $0x180] sm:$0x3] }
  0xb9   :  { %931 = vst [vmem:[%s1364_s1 + $0x7c] sm:$0x3] %v572_v14  ;;  %932 = vst [vmem:[%s1364_s1 + $0x7e] sm:$0x3] %v578_v15  ;;  %v494_v17 = vld [vmem:[#allocation2 + $0x188] sm:$0x3] }
  0xba   :  { %917 = vst [vmem:[%s1364_s1 + $0x60] sm:$0x3] %v488_v16  ;;  %v500_v18 = vld [vmem:[#allocation2 + $0x190] sm:$0x3]  ;;  %v506_v19 = vld [vmem:[#allocation2 + $0x198] sm:$0x3] }
  0xbb   :  { %918 = vst [vmem:[%s1364_s1 + $0x62] sm:$0x3] %v494_v17  ;;  %919 = vst [vmem:[%s1364_s1 + $0x64] sm:$0x3] %v500_v18  ;;  %v512_v20 = vld [vmem:[#allocation2 + $0x1a0] sm:$0x3] }
  0xbc   :  { %920 = vst [vmem:[%s1364_s1 + $0x66] sm:$0x3] %v506_v19  ;;  %v518_v21 = vld [vmem:[#allocation2 + $0x1a8] sm:$0x3]  ;;  %v524_v22 = vld [vmem:[#allocation2 + $0x1b0] sm:$0x3] }
  0xbd   :  { %921 = vst [vmem:[%s1364_s1 + $0x68] sm:$0x3] %v512_v20  ;;  %922 = vst [vmem:[%s1364_s1 + $0x6a] sm:$0x3] %v518_v21  ;;  %v530_v23 = vld [vmem:[#allocation2 + $0x1b8] sm:$0x3] }
  0xbe   :  { %923 = vst [vmem:[%s1364_s1 + $0x6c] sm:$0x3] %v524_v22  ;;  %v632_v24 = vld [vmem:[#allocation2 + $0x240] sm:$0x3]  ;;  %v638_v25 = vld [vmem:[#allocation2 + $0x248] sm:$0x3] }
  0xbf   :  { %924 = vst [vmem:[%s1364_s1 + $0x6e] sm:$0x3] %v530_v23  ;;  %941 = vst [vmem:[%s1364_s1 + $0x90] sm:$0x3] %v632_v24  ;;  %v644_v26 = vld [vmem:[#allocation2 + $0x250] sm:$0x3] }
  0xc0   :  { %942 = vst [vmem:[%s1364_s1 + $0x92] sm:$0x3] %v638_v25  ;;  %v650_v27 = vld [vmem:[#allocation2 + $0x258] sm:$0x3]  ;;  %v656_v28 = vld [vmem:[#allocation2 + $0x260] sm:$0x3] }
  0xc1   :  { %943 = vst [vmem:[%s1364_s1 + $0x94] sm:$0x3] %v644_v26  ;;  %944 = vst [vmem:[%s1364_s1 + $0x96] sm:$0x3] %v650_v27  ;;  %v662_v29 = vld [vmem:[#allocation2 + $0x268] sm:$0x3] }
  0xc2   :  { %945 = vst [vmem:[%s1364_s1 + $0x98] sm:$0x3] %v656_v28  ;;  %v668_v30 = vld [vmem:[#allocation2 + $0x270] sm:$0x3]  ;;  %v674_v31 = vld [vmem:[#allocation2 + $0x278] sm:$0x3] }
  0xc3   :  { %946 = vst [vmem:[%s1364_s1 + $0x9a] sm:$0x3] %v662_v29  ;;  %947 = vst [vmem:[%s1364_s1 + $0x9c] sm:$0x3] %v668_v30  ;;  %v584_v32 = vld [vmem:[#allocation2 + $0x200] sm:$0x3] }
  0xc4   :  { %948 = vst [vmem:[%s1364_s1 + $0x9e] sm:$0x3] %v674_v31  ;;  %v590_v33 = vld [vmem:[#allocation2 + $0x208] sm:$0x3]  ;;  %v596_v34 = vld [vmem:[#allocation2 + $0x210] sm:$0x3] }
  0xc5   :  { %933 = vst [vmem:[%s1364_s1 + $0x80] sm:$0x3] %v584_v32  ;;  %934 = vst [vmem:[%s1364_s1 + $0x82] sm:$0x3] %v590_v33  ;;  %v602_v35 = vld [vmem:[#allocation2 + $0x218] sm:$0x3] }
  0xc6   :  { %935 = vst [vmem:[%s1364_s1 + $0x84] sm:$0x3] %v596_v34  ;;  %v608_v36 = vld [vmem:[#allocation2 + $0x220] sm:$0x3]  ;;  %v614_v37 = vld [vmem:[#allocation2 + $0x228] sm:$0x3] }
  0xc7   :  { %936 = vst [vmem:[%s1364_s1 + $0x86] sm:$0x3] %v602_v35  ;;  %937 = vst [vmem:[%s1364_s1 + $0x88] sm:$0x3] %v608_v36  ;;  %v620_v38 = vld [vmem:[#allocation2 + $0x230] sm:$0x3] }
  0xc8   :  { %938 = vst [vmem:[%s1364_s1 + $0x8a] sm:$0x3] %v614_v37  ;;  %v626_v39 = vld [vmem:[#allocation2 + $0x238] sm:$0x3]  ;;  %v728_v40 = vld [vmem:[#allocation2 + $0x2c0] sm:$0x3] }
  0xc9   :  { %939 = vst [vmem:[%s1364_s1 + $0x8c] sm:$0x3] %v620_v38  ;;  %940 = vst [vmem:[%s1364_s1 + $0x8e] sm:$0x3] %v626_v39  ;;  %v734_v41 = vld [vmem:[#allocation2 + $0x2c8] sm:$0x3] }
  0xca   :  { %957 = vst [vmem:[%s1364_s1 + $0xb0] sm:$0x3] %v728_v40  ;;  %v740_v42 = vld [vmem:[#allocation2 + $0x2d0] sm:$0x3]  ;;  %v746_v43 = vld [vmem:[#allocation2 + $0x2d8] sm:$0x3] }
  0xcb   :  { %958 = vst [vmem:[%s1364_s1 + $0xb2] sm:$0x3] %v734_v41  ;;  %959 = vst [vmem:[%s1364_s1 + $0xb4] sm:$0x3] %v740_v42  ;;  %v752_v44 = vld [vmem:[#allocation2 + $0x2e0] sm:$0x3] }
  0xcc   :  { %960 = vst [vmem:[%s1364_s1 + $0xb6] sm:$0x3] %v746_v43  ;;  %v758_v45 = vld [vmem:[#allocation2 + $0x2e8] sm:$0x3]  ;;  %v764_v46 = vld [vmem:[#allocation2 + $0x2f0] sm:$0x3] }
  0xcd   :  { %961 = vst [vmem:[%s1364_s1 + $0xb8] sm:$0x3] %v752_v44  ;;  %962 = vst [vmem:[%s1364_s1 + $0xba] sm:$0x3] %v758_v45  ;;  %v770_v47 = vld [vmem:[#allocation2 + $0x2f8] sm:$0x3] }
  0xce   :  { %963 = vst [vmem:[%s1364_s1 + $0xbc] sm:$0x3] %v764_v46  ;;  %v680_v48 = vld [vmem:[#allocation2 + $0x280] sm:$0x3]  ;;  %v686_v49 = vld [vmem:[#allocation2 + $0x288] sm:$0x3] }
  0xcf   :  { %964 = vst [vmem:[%s1364_s1 + $0xbe] sm:$0x3] %v770_v47  ;;  %949 = vst [vmem:[%s1364_s1 + $0xa0] sm:$0x3] %v680_v48  ;;  %v692_v50 = vld [vmem:[#allocation2 + $0x290] sm:$0x3] }
  0xd0   :  { %950 = vst [vmem:[%s1364_s1 + $0xa2] sm:$0x3] %v686_v49  ;;  %v698_v51 = vld [vmem:[#allocation2 + $0x298] sm:$0x3]  ;;  %v704_v52 = vld [vmem:[#allocation2 + $0x2a0] sm:$0x3] }
  0xd1   :  { %951 = vst [vmem:[%s1364_s1 + $0xa4] sm:$0x3] %v692_v50  ;;  %952 = vst [vmem:[%s1364_s1 + $0xa6] sm:$0x3] %v698_v51  ;;  %v710_v53 = vld [vmem:[#allocation2 + $0x2a8] sm:$0x3] }
  0xd2   :  { %953 = vst [vmem:[%s1364_s1 + $0xa8] sm:$0x3] %v704_v52  ;;  %v716_v54 = vld [vmem:[#allocation2 + $0x2b0] sm:$0x3]  ;;  %v722_v55 = vld [vmem:[#allocation2 + $0x2b8] sm:$0x3] }
  0xd3   :  { %954 = vst [vmem:[%s1364_s1 + $0xaa] sm:$0x3] %v710_v53  ;;  %955 = vst [vmem:[%s1364_s1 + $0xac] sm:$0x3] %v716_v54 }
  0xd4   :  { %956 = vst [vmem:[%s1364_s1 + $0xae] sm:$0x3] %v722_v55 }
  0xd5   :  { %775 = vsyncpa [#allocation1], 1 }

// kernel: squeeze.4
= control target key start
LH: loop header
LB: loop body
LE: loop exit
PB: predicated region body
PF: predicated region fallthrough
CT: control target
= control target key end

     0   :  { %vm3_vm0 = vcmask 130048   ;;  %s977_s12 = smov 112   ;;  %s1372_s0 = inlined_call_operand.vmem [shape: f32[1,3,32,32], index: 0, kind: input, shape index: {}]   ;;  %s1373_s1 = inlined_call_operand.vmem [shape: f32[3,2,16,2,16], index: 1, kind: output, shape index: {}]  }
   0x1   :  { %v871_v0 = vld [vmem:[%s1372_s0 + $0x10] sm:$0xff]   ;;  %v83_v1 = vld [vmem:[%s1372_s0] sm:$0xff]   ;;  %v872_v2 = vld [vmem:[%s1372_s0 + $0x18] sm:$0xff]  }
   0x2   :  { %102 = vrot.lane.b32.xlu1 %v871_v0, %s977_s12  ;;  %84 = vrot.lane.b32.xlu0 %v83_v1, %s977_s12  ;;  %v870_v3 = vld [vmem:[%s1372_s0 + $0x8] sm:$0xff]   ;;  %17 = vst.msk [vmem:[#allocation0 + $0x80] ss:$8 sm:$0xf] %vm3_vm0, %v871_v0   ;;  %v873_v5 = vld [vmem:[%s1372_s0 + $0x20] sm:$0xff]  }
   0x3   :  { %v874_v4 = vld [vmem:[%s1372_s0 + $0x28] sm:$0xff]   ;;  %19 = vst.msk [vmem:[#allocation0 + $0x80] ss:$8 sm:$0xf0] %vm3_vm0, %v871_v0   ;;  %v876_v6 = vld [vmem:[%s1372_s0 + $0x38] sm:$0xff]   ;;  %v875_v7 = vld [vmem:[%s1372_s0 + $0x30] sm:$0xff]  }
   0x4   :  { %4 = vst.msk [vmem:[#allocation0] ss:$8 sm:$0xf] %vm3_vm0, %v83_v1   ;;  %5 = vst.msk [vmem:[#allocation0] ss:$8 sm:$0xf0] %vm3_vm0, %v83_v1  }
   0x5   :  { %24 = vst.msk [vmem:[#allocation0 + $0xc0] ss:$8 sm:$0xf] %vm3_vm0, %v872_v2   ;;  %26 = vst.msk [vmem:[#allocation0 + $0xc0] ss:$8 sm:$0xf0] %vm3_vm0, %v872_v2  }
   0x6   :  { %10 = vst.msk [vmem:[#allocation0 + $0x40] ss:$8 sm:$0xf] %vm3_vm0, %v870_v3   ;;  %12 = vst.msk [vmem:[#allocation0 + $0x40] ss:$8 sm:$0xf0] %vm3_vm0, %v870_v3   ;;  %111 = vrot.lane.b32.xlu1 %v872_v2, %s977_s12  ;;  %93 = vrot.lane.b32.xlu0 %v870_v3, %s977_s12 }
   0x7   :  { %38 = vst.msk [vmem:[#allocation0 + $0x140] ss:$8 sm:$0xf] %vm3_vm0, %v874_v4   ;;  %40 = vst.msk [vmem:[#allocation0 + $0x140] ss:$8 sm:$0xf0] %vm3_vm0, %v874_v4  }
   0x8   :  { %v878_v8 = vld [vmem:[%s1372_s0 + $0x48] sm:$0xff]   ;;  %v877_v9 = vld [vmem:[%s1372_s0 + $0x40] sm:$0xff]   ;;  %v880_v10 = vld [vmem:[%s1372_s0 + $0x58] sm:$0xff]   ;;  %31 = vst.msk [vmem:[#allocation0 + $0x100] ss:$8 sm:$0xf] %vm3_vm0, %v873_v5  }
   0x9   :  { %33 = vst.msk [vmem:[#allocation0 + $0x100] ss:$8 sm:$0xf0] %vm3_vm0, %v873_v5   ;;  %52 = vst.msk [vmem:[#allocation0 + $0x1c0] ss:$8 sm:$0xf] %vm3_vm0, %v876_v6  }
   0xa   :  { %54 = vst.msk [vmem:[#allocation0 + $0x1c0] ss:$8 sm:$0xf0] %vm3_vm0, %v876_v6   ;;  %45 = vst.msk [vmem:[#allocation0 + $0x180] ss:$8 sm:$0xf] %vm3_vm0, %v875_v7   ;;  %129 = vrot.lane.b32.xlu1 %v874_v4, %s977_s12  ;;  %120 = vrot.lane.b32.xlu0 %v873_v5, %s977_s12 }
   0xb   :  { %47 = vst.msk [vmem:[#allocation0 + $0x180] ss:$8 sm:$0xf0] %vm3_vm0, %v875_v7   ;;  %v879_v11 = vld [vmem:[%s1372_s0 + $0x50] sm:$0xff]  }
   0xc   :  { %66 = vst.msk [vmem:[#allocation0 + $0x240] ss:$8 sm:$0xf] %vm3_vm0, %v878_v8   ;;  %68 = vst.msk [vmem:[#allocation0 + $0x240] ss:$8 sm:$0xf0] %vm3_vm0, %v878_v8  }
   0xd   :  { %59 = vst.msk [vmem:[#allocation0 + $0x200] ss:$8 sm:$0xf] %vm3_vm0, %v877_v9   ;;  %61 = vst.msk [vmem:[#allocation0 + $0x200] ss:$8 sm:$0xf0] %vm3_vm0, %v877_v9  }
   0xe   :  { %80 = vst.msk [vmem:[#allocation0 + $0x2c0] ss:$8 sm:$0xf] %vm3_vm0, %v880_v10   ;;  %82 = vst.msk [vmem:[#allocation0 + $0x2c0] ss:$8 sm:$0xf0] %vm3_vm0, %v880_v10   ;;  %147 = vrot.lane.b32.xlu1 %v876_v6, %s977_s12  ;;  %138 = vrot.lane.b32.xlu0 %v875_v7, %s977_s12 }
   0xf   :  { %73 = vst.msk [vmem:[#allocation0 + $0x280] ss:$8 sm:$0xf] %vm3_vm0, %v879_v11   ;;  %75 = vst.msk [vmem:[#allocation0 + $0x280] ss:$8 sm:$0xf0] %vm3_vm0, %v879_v11  }
  0x12   :  { %165 = vrot.lane.b32.xlu1 %v878_v8, %s977_s12  ;;  %156 = vrot.lane.b32.xlu0 %v877_v9, %s977_s12 }
  0x16   :  { %183 = vrot.lane.b32.xlu1 %v880_v10, %s977_s12  ;;  %174 = vrot.lane.b32.xlu0 %v879_v11, %s977_s12 }
  0x74   :  { %v103_v12 = vpop.permute.xlu1 %102   ;;  %v85_v13 = vpop.permute.xlu0 %84  }
  0x75   :  { %106 = vst.msk [vmem:[#allocation0 + $0x81] ss:$8 sm:$0xf] %vm3_vm0, %v103_v12   ;;  %108 = vst.msk [vmem:[#allocation0 + $0x81] ss:$8 sm:$0xf0] %vm3_vm0, %v103_v12  }
  0x76   :  { %88 = vst.msk [vmem:[#allocation0 + $0x1] ss:$8 sm:$0xf] %vm3_vm0, %v85_v13   ;;  %90 = vst.msk [vmem:[#allocation0 + $0x1] ss:$8 sm:$0xf0] %vm3_vm0, %v85_v13  }
  0x78   :  { %v112_v14 = vpop.permute.xlu1 %111   ;;  %v94_v15 = vpop.permute.xlu0 %93  }
  0x79   :  { %115 = vst.msk [vmem:[#allocation0 + $0xc1] ss:$8 sm:$0xf] %vm3_vm0, %v112_v14   ;;  %117 = vst.msk [vmem:[#allocation0 + $0xc1] ss:$8 sm:$0xf0] %vm3_vm0, %v112_v14  }
  0x7a   :  { %97 = vst.msk [vmem:[#allocation0 + $0x41] ss:$8 sm:$0xf] %vm3_vm0, %v94_v15   ;;  %99 = vst.msk [vmem:[#allocation0 + $0x41] ss:$8 sm:$0xf0] %vm3_vm0, %v94_v15  }
  0x7c   :  { %v286_v16 = vld [vmem:[#allocation0 + $0x80] sm:$0x3]  ;;  %v292_v17 = vld [vmem:[#allocation0 + $0x88] sm:$0x3]  ;;  %v298_v18 = vld [vmem:[#allocation0 + $0x90] sm:$0x3]  ;;  %v130_v19 = vpop.permute.xlu1 %129   ;;  %v121_v20 = vpop.permute.xlu0 %120  }
  0x7d   :  { %896 = vst [vmem:[%s1373_s1 + $0x20] sm:$0x3] %v286_v16  ;;  %897 = vst [vmem:[%s1373_s1 + $0x22] sm:$0x3] %v292_v17  ;;  %v304_v21 = vld [vmem:[#allocation0 + $0x98] sm:$0x3] }
  0x7e   :  { %898 = vst [vmem:[%s1373_s1 + $0x24] sm:$0x3] %v298_v18  ;;  %v310_v22 = vld [vmem:[#allocation0 + $0xa0] sm:$0x3]  ;;  %v316_v23 = vld [vmem:[#allocation0 + $0xa8] sm:$0x3] }
  0x7f   :  { %133 = vst.msk [vmem:[#allocation0 + $0x141] ss:$8 sm:$0xf] %vm3_vm0, %v130_v19   ;;  %135 = vst.msk [vmem:[#allocation0 + $0x141] ss:$8 sm:$0xf0] %vm3_vm0, %v130_v19  }
  0x80   :  { %124 = vst.msk [vmem:[#allocation0 + $0x101] ss:$8 sm:$0xf] %vm3_vm0, %v121_v20   ;;  %126 = vst.msk [vmem:[#allocation0 + $0x101] ss:$8 sm:$0xf0] %vm3_vm0, %v121_v20   ;;  %v148_v33 = vpop.permute.xlu1 %147   ;;  %v139_v34 = vpop.permute.xlu0 %138  }
  0x81   :  { %899 = vst [vmem:[%s1373_s1 + $0x26] sm:$0x3] %v304_v21  ;;  %900 = vst [vmem:[%s1373_s1 + $0x28] sm:$0x3] %v310_v22  ;;  %v322_v24 = vld [vmem:[#allocation0 + $0xb0] sm:$0x3] }
  0x82   :  { %901 = vst [vmem:[%s1373_s1 + $0x2a] sm:$0x3] %v316_v23  ;;  %v328_v25 = vld [vmem:[#allocation0 + $0xb8] sm:$0x3]  ;;  %v193_v26 = vld [vmem:[#allocation0] sm:$0x3] }
  0x83   :  { %902 = vst [vmem:[%s1373_s1 + $0x2c] sm:$0x3] %v322_v24  ;;  %903 = vst [vmem:[%s1373_s1 + $0x2e] sm:$0x3] %v328_v25  ;;  %v197_v27 = vld [vmem:[#allocation0 + $0x8] sm:$0x3] }
  0x84   :  { %195 = vst [vmem:[%s1373_s1] sm:$0x3] %v193_v26  ;;  %v202_v28 = vld [vmem:[#allocation0 + $0x10] sm:$0x3]  ;;  %v208_v29 = vld [vmem:[#allocation0 + $0x18] sm:$0x3]  ;;  %v166_v47 = vpop.permute.xlu1 %165   ;;  %v157_v48 = vpop.permute.xlu0 %156  }
  0x85   :  { %881 = vst [vmem:[%s1373_s1 + $0x2] sm:$0x3] %v197_v27  ;;  %882 = vst [vmem:[%s1373_s1 + $0x4] sm:$0x3] %v202_v28  ;;  %v214_v30 = vld [vmem:[#allocation0 + $0x20] sm:$0x3] }
  0x86   :  { %883 = vst [vmem:[%s1373_s1 + $0x6] sm:$0x3] %v208_v29  ;;  %v220_v31 = vld [vmem:[#allocation0 + $0x28] sm:$0x3]  ;;  %v226_v32 = vld [vmem:[#allocation0 + $0x30] sm:$0x3] }
  0x87   :  { %884 = vst [vmem:[%s1373_s1 + $0x8] sm:$0x3] %v214_v30  ;;  %885 = vst [vmem:[%s1373_s1 + $0xa] sm:$0x3] %v220_v31  ;;  %v232_v35 = vld [vmem:[#allocation0 + $0x38] sm:$0x3] }
  0x88   :  { %886 = vst [vmem:[%s1373_s1 + $0xc] sm:$0x3] %v226_v32  ;;  %v334_v36 = vld [vmem:[#allocation0 + $0xc0] sm:$0x3]  ;;  %v340_v37 = vld [vmem:[#allocation0 + $0xc8] sm:$0x3]  ;;  %v184_v61 = vpop.permute.xlu1 %183   ;;  %v175_v62 = vpop.permute.xlu0 %174  }
  0x89   :  { %151 = vst.msk [vmem:[#allocation0 + $0x1c1] ss:$8 sm:$0xf] %vm3_vm0, %v148_v33   ;;  %153 = vst.msk [vmem:[#allocation0 + $0x1c1] ss:$8 sm:$0xf0] %vm3_vm0, %v148_v33  }
  0x8a   :  { %142 = vst.msk [vmem:[#allocation0 + $0x181] ss:$8 sm:$0xf] %vm3_vm0, %v139_v34   ;;  %144 = vst.msk [vmem:[#allocation0 + $0x181] ss:$8 sm:$0xf0] %vm3_vm0, %v139_v34  }
  0x8b   :  { %887 = vst [vmem:[%s1373_s1 + $0xe] sm:$0x3] %v232_v35  ;;  %904 = vst [vmem:[%s1373_s1 + $0x30] sm:$0x3] %v334_v36  ;;  %v346_v38 = vld [vmem:[#allocation0 + $0xd0] sm:$0x3] }
  0x8c   :  { %905 = vst [vmem:[%s1373_s1 + $0x32] sm:$0x3] %v340_v37  ;;  %v352_v39 = vld [vmem:[#allocation0 + $0xd8] sm:$0x3]  ;;  %v358_v40 = vld [vmem:[#allocation0 + $0xe0] sm:$0x3] }
  0x8d   :  { %906 = vst [vmem:[%s1373_s1 + $0x34] sm:$0x3] %v346_v38  ;;  %907 = vst [vmem:[%s1373_s1 + $0x36] sm:$0x3] %v352_v39  ;;  %v364_v41 = vld [vmem:[#allocation0 + $0xe8] sm:$0x3] }
  0x8e   :  { %908 = vst [vmem:[%s1373_s1 + $0x38] sm:$0x3] %v358_v40  ;;  %v370_v42 = vld [vmem:[#allocation0 + $0xf0] sm:$0x3]  ;;  %v376_v43 = vld [vmem:[#allocation0 + $0xf8] sm:$0x3] }
  0x8f   :  { %909 = vst [vmem:[%s1373_s1 + $0x3a] sm:$0x3] %v364_v41  ;;  %910 = vst [vmem:[%s1373_s1 + $0x3c] sm:$0x3] %v370_v42  ;;  %v238_v44 = vld [vmem:[#allocation0 + $0x40] sm:$0x3] }
  0x90   :  { %911 = vst [vmem:[%s1373_s1 + $0x3e] sm:$0x3] %v376_v43  ;;  %v244_v45 = vld [vmem:[#allocation0 + $0x48] sm:$0x3]  ;;  %v250_v46 = vld [vmem:[#allocation0 + $0x50] sm:$0x3] }
  0x91   :  { %888 = vst [vmem:[%s1373_s1 + $0x10] sm:$0x3] %v238_v44  ;;  %889 = vst [vmem:[%s1373_s1 + $0x12] sm:$0x3] %v244_v45  ;;  %v256_v49 = vld [vmem:[#allocation0 + $0x58] sm:$0x3] }
  0x92   :  { %890 = vst [vmem:[%s1373_s1 + $0x14] sm:$0x3] %v250_v46  ;;  %v262_v50 = vld [vmem:[#allocation0 + $0x60] sm:$0x3]  ;;  %v268_v51 = vld [vmem:[#allocation0 + $0x68] sm:$0x3] }
  0x93   :  { %169 = vst.msk [vmem:[#allocation0 + $0x241] ss:$8 sm:$0xf] %vm3_vm0, %v166_v47   ;;  %171 = vst.msk [vmem:[#allocation0 + $0x241] ss:$8 sm:$0xf0] %vm3_vm0, %v166_v47  }
  0x94   :  { %160 = vst.msk [vmem:[#allocation0 + $0x201] ss:$8 sm:$0xf] %vm3_vm0, %v157_v48   ;;  %162 = vst.msk [vmem:[#allocation0 + $0x201] ss:$8 sm:$0xf0] %vm3_vm0, %v157_v48  }
  0x95   :  { %891 = vst [vmem:[%s1373_s1 + $0x16] sm:$0x3] %v256_v49  ;;  %892 = vst [vmem:[%s1373_s1 + $0x18] sm:$0x3] %v262_v50  ;;  %v274_v52 = vld [vmem:[#allocation0 + $0x70] sm:$0x3] }
  0x96   :  { %893 = vst [vmem:[%s1373_s1 + $0x1a] sm:$0x3] %v268_v51  ;;  %v280_v53 = vld [vmem:[#allocation0 + $0x78] sm:$0x3]  ;;  %v430_v54 = vld [vmem:[#allocation0 + $0x140] sm:$0x3] }
  0x97   :  { %894 = vst [vmem:[%s1373_s1 + $0x1c] sm:$0x3] %v274_v52  ;;  %895 = vst [vmem:[%s1373_s1 + $0x1e] sm:$0x3] %v280_v53  ;;  %v436_v55 = vld [vmem:[#allocation0 + $0x148] sm:$0x3] }
  0x98   :  { %920 = vst [vmem:[%s1373_s1 + $0x50] sm:$0x3] %v430_v54  ;;  %v442_v56 = vld [vmem:[#allocation0 + $0x150] sm:$0x3]  ;;  %v448_v57 = vld [vmem:[#allocation0 + $0x158] sm:$0x3] }
  0x99   :  { %921 = vst [vmem:[%s1373_s1 + $0x52] sm:$0x3] %v436_v55  ;;  %922 = vst [vmem:[%s1373_s1 + $0x54] sm:$0x3] %v442_v56  ;;  %v454_v58 = vld [vmem:[#allocation0 + $0x160] sm:$0x3] }
  0x9a   :  { %923 = vst [vmem:[%s1373_s1 + $0x56] sm:$0x3] %v448_v57  ;;  %v460_v59 = vld [vmem:[#allocation0 + $0x168] sm:$0x3]  ;;  %v466_v60 = vld [vmem:[#allocation0 + $0x170] sm:$0x3] }
  0x9b   :  { %924 = vst [vmem:[%s1373_s1 + $0x58] sm:$0x3] %v454_v58  ;;  %925 = vst [vmem:[%s1373_s1 + $0x5a] sm:$0x3] %v460_v59  ;;  %v472_v63 = vld [vmem:[#allocation0 + $0x178] sm:$0x3] }
  0x9c   :  { %926 = vst [vmem:[%s1373_s1 + $0x5c] sm:$0x3] %v466_v60  ;;  %v382_v0 = vld [vmem:[#allocation0 + $0x100] sm:$0x3]  ;;  %v388_v1 = vld [vmem:[#allocation0 + $0x108] sm:$0x3] }
  0x9d   :  { %187 = vst.msk [vmem:[#allocation0 + $0x2c1] ss:$8 sm:$0xf] %vm3_vm0, %v184_v61   ;;  %189 = vst.msk [vmem:[#allocation0 + $0x2c1] ss:$8 sm:$0xf0] %vm3_vm0, %v184_v61  }
  0x9e   :  { %178 = vst.msk [vmem:[#allocation0 + $0x281] ss:$8 sm:$0xf] %vm3_vm0, %v175_v62   ;;  %180 = vst.msk [vmem:[#allocation0 + $0x281] ss:$8 sm:$0xf0] %vm3_vm0, %v175_v62  }
  0x9f   :  { %927 = vst [vmem:[%s1373_s1 + $0x5e] sm:$0x3] %v472_v63  ;;  %912 = vst [vmem:[%s1373_s1 + $0x40] sm:$0x3] %v382_v0  ;;  %v394_v2 = vld [vmem:[#allocation0 + $0x110] sm:$0x3] }
  0xa0   :  { %913 = vst [vmem:[%s1373_s1 + $0x42] sm:$0x3] %v388_v1  ;;  %v400_v3 = vld [vmem:[#allocation0 + $0x118] sm:$0x3]  ;;  %v406_v4 = vld [vmem:[#allocation0 + $0x120] sm:$0x3] }
  0xa1   :  { %914 = vst [vmem:[%s1373_s1 + $0x44] sm:$0x3] %v394_v2  ;;  %915 = vst [vmem:[%s1373_s1 + $0x46] sm:$0x3] %v400_v3  ;;  %v412_v5 = vld [vmem:[#allocation0 + $0x128] sm:$0x3] }
  0xa2   :  { %916 = vst [vmem:[%s1373_s1 + $0x48] sm:$0x3] %v406_v4  ;;  %v418_v6 = vld [vmem:[#allocation0 + $0x130] sm:$0x3]  ;;  %v424_v7 = vld [vmem:[#allocation0 + $0x138] sm:$0x3] }
  0xa3   :  { %917 = vst [vmem:[%s1373_s1 + $0x4a] sm:$0x3] %v412_v5  ;;  %918 = vst [vmem:[%s1373_s1 + $0x4c] sm:$0x3] %v418_v6  ;;  %v526_v8 = vld [vmem:[#allocation0 + $0x1c0] sm:$0x3] }
  0xa4   :  { %919 = vst [vmem:[%s1373_s1 + $0x4e] sm:$0x3] %v424_v7  ;;  %v532_v9 = vld [vmem:[#allocation0 + $0x1c8] sm:$0x3]  ;;  %v538_v10 = vld [vmem:[#allocation0 + $0x1d0] sm:$0x3] }
  0xa5   :  { %936 = vst [vmem:[%s1373_s1 + $0x70] sm:$0x3] %v526_v8  ;;  %937 = vst [vmem:[%s1373_s1 + $0x72] sm:$0x3] %v532_v9  ;;  %v544_v11 = vld [vmem:[#allocation0 + $0x1d8] sm:$0x3] }
  0xa6   :  { %938 = vst [vmem:[%s1373_s1 + $0x74] sm:$0x3] %v538_v10  ;;  %v550_v12 = vld [vmem:[#allocation0 + $0x1e0] sm:$0x3]  ;;  %v556_v13 = vld [vmem:[#allocation0 + $0x1e8] sm:$0x3] }
  0xa7   :  { %939 = vst [vmem:[%s1373_s1 + $0x76] sm:$0x3] %v544_v11  ;;  %940 = vst [vmem:[%s1373_s1 + $0x78] sm:$0x3] %v550_v12  ;;  %v562_v14 = vld [vmem:[#allocation0 + $0x1f0] sm:$0x3] }
  0xa8   :  { %941 = vst [vmem:[%s1373_s1 + $0x7a] sm:$0x3] %v556_v13  ;;  %v568_v15 = vld [vmem:[#allocation0 + $0x1f8] sm:$0x3]  ;;  %v478_v16 = vld [vmem:[#allocation0 + $0x180] sm:$0x3] }
  0xa9   :  { %942 = vst [vmem:[%s1373_s1 + $0x7c] sm:$0x3] %v562_v14  ;;  %943 = vst [vmem:[%s1373_s1 + $0x7e] sm:$0x3] %v568_v15  ;;  %v484_v17 = vld [vmem:[#allocation0 + $0x188] sm:$0x3] }
  0xaa   :  { %928 = vst [vmem:[%s1373_s1 + $0x60] sm:$0x3] %v478_v16  ;;  %v490_v18 = vld [vmem:[#allocation0 + $0x190] sm:$0x3]  ;;  %v496_v19 = vld [vmem:[#allocation0 + $0x198] sm:$0x3] }
  0xab   :  { %929 = vst [vmem:[%s1373_s1 + $0x62] sm:$0x3] %v484_v17  ;;  %930 = vst [vmem:[%s1373_s1 + $0x64] sm:$0x3] %v490_v18  ;;  %v502_v20 = vld [vmem:[#allocation0 + $0x1a0] sm:$0x3] }
  0xac   :  { %931 = vst [vmem:[%s1373_s1 + $0x66] sm:$0x3] %v496_v19  ;;  %v508_v21 = vld [vmem:[#allocation0 + $0x1a8] sm:$0x3]  ;;  %v514_v22 = vld [vmem:[#allocation0 + $0x1b0] sm:$0x3] }
  0xad   :  { %932 = vst [vmem:[%s1373_s1 + $0x68] sm:$0x3] %v502_v20  ;;  %933 = vst [vmem:[%s1373_s1 + $0x6a] sm:$0x3] %v508_v21  ;;  %v520_v23 = vld [vmem:[#allocation0 + $0x1b8] sm:$0x3] }
  0xae   :  { %934 = vst [vmem:[%s1373_s1 + $0x6c] sm:$0x3] %v514_v22  ;;  %v622_v24 = vld [vmem:[#allocation0 + $0x240] sm:$0x3]  ;;  %v628_v25 = vld [vmem:[#allocation0 + $0x248] sm:$0x3] }
  0xaf   :  { %935 = vst [vmem:[%s1373_s1 + $0x6e] sm:$0x3] %v520_v23  ;;  %952 = vst [vmem:[%s1373_s1 + $0x90] sm:$0x3] %v622_v24  ;;  %v634_v26 = vld [vmem:[#allocation0 + $0x250] sm:$0x3] }
  0xb0   :  { %953 = vst [vmem:[%s1373_s1 + $0x92] sm:$0x3] %v628_v25  ;;  %v640_v27 = vld [vmem:[#allocation0 + $0x258] sm:$0x3]  ;;  %v646_v28 = vld [vmem:[#allocation0 + $0x260] sm:$0x3] }
  0xb1   :  { %954 = vst [vmem:[%s1373_s1 + $0x94] sm:$0x3] %v634_v26  ;;  %955 = vst [vmem:[%s1373_s1 + $0x96] sm:$0x3] %v640_v27  ;;  %v652_v29 = vld [vmem:[#allocation0 + $0x268] sm:$0x3] }
  0xb2   :  { %956 = vst [vmem:[%s1373_s1 + $0x98] sm:$0x3] %v646_v28  ;;  %v658_v30 = vld [vmem:[#allocation0 + $0x270] sm:$0x3]  ;;  %v664_v31 = vld [vmem:[#allocation0 + $0x278] sm:$0x3] }
  0xb3   :  { %957 = vst [vmem:[%s1373_s1 + $0x9a] sm:$0x3] %v652_v29  ;;  %958 = vst [vmem:[%s1373_s1 + $0x9c] sm:$0x3] %v658_v30  ;;  %v574_v32 = vld [vmem:[#allocation0 + $0x200] sm:$0x3] }
  0xb4   :  { %959 = vst [vmem:[%s1373_s1 + $0x9e] sm:$0x3] %v664_v31  ;;  %v580_v33 = vld [vmem:[#allocation0 + $0x208] sm:$0x3]  ;;  %v586_v34 = vld [vmem:[#allocation0 + $0x210] sm:$0x3] }
  0xb5   :  { %944 = vst [vmem:[%s1373_s1 + $0x80] sm:$0x3] %v574_v32  ;;  %945 = vst [vmem:[%s1373_s1 + $0x82] sm:$0x3] %v580_v33  ;;  %v592_v35 = vld [vmem:[#allocation0 + $0x218] sm:$0x3] }
  0xb6   :  { %946 = vst [vmem:[%s1373_s1 + $0x84] sm:$0x3] %v586_v34  ;;  %v598_v36 = vld [vmem:[#allocation0 + $0x220] sm:$0x3]  ;;  %v604_v37 = vld [vmem:[#allocation0 + $0x228] sm:$0x3] }
  0xb7   :  { %947 = vst [vmem:[%s1373_s1 + $0x86] sm:$0x3] %v592_v35  ;;  %948 = vst [vmem:[%s1373_s1 + $0x88] sm:$0x3] %v598_v36  ;;  %v610_v38 = vld [vmem:[#allocation0 + $0x230] sm:$0x3] }
  0xb8   :  { %949 = vst [vmem:[%s1373_s1 + $0x8a] sm:$0x3] %v604_v37  ;;  %v616_v39 = vld [vmem:[#allocation0 + $0x238] sm:$0x3]  ;;  %v718_v40 = vld [vmem:[#allocation0 + $0x2c0] sm:$0x3] }
  0xb9   :  { %950 = vst [vmem:[%s1373_s1 + $0x8c] sm:$0x3] %v610_v38  ;;  %951 = vst [vmem:[%s1373_s1 + $0x8e] sm:$0x3] %v616_v39  ;;  %v724_v41 = vld [vmem:[#allocation0 + $0x2c8] sm:$0x3] }
  0xba   :  { %968 = vst [vmem:[%s1373_s1 + $0xb0] sm:$0x3] %v718_v40  ;;  %v730_v42 = vld [vmem:[#allocation0 + $0x2d0] sm:$0x3]  ;;  %v736_v43 = vld [vmem:[#allocation0 + $0x2d8] sm:$0x3] }
  0xbb   :  { %969 = vst [vmem:[%s1373_s1 + $0xb2] sm:$0x3] %v724_v41  ;;  %970 = vst [vmem:[%s1373_s1 + $0xb4] sm:$0x3] %v730_v42  ;;  %v742_v44 = vld [vmem:[#allocation0 + $0x2e0] sm:$0x3] }
  0xbc   :  { %971 = vst [vmem:[%s1373_s1 + $0xb6] sm:$0x3] %v736_v43  ;;  %v748_v45 = vld [vmem:[#allocation0 + $0x2e8] sm:$0x3]  ;;  %v754_v46 = vld [vmem:[#allocation0 + $0x2f0] sm:$0x3] }
  0xbd   :  { %972 = vst [vmem:[%s1373_s1 + $0xb8] sm:$0x3] %v742_v44  ;;  %973 = vst [vmem:[%s1373_s1 + $0xba] sm:$0x3] %v748_v45  ;;  %v760_v47 = vld [vmem:[#allocation0 + $0x2f8] sm:$0x3] }
  0xbe   :  { %974 = vst [vmem:[%s1373_s1 + $0xbc] sm:$0x3] %v754_v46  ;;  %v670_v48 = vld [vmem:[#allocation0 + $0x280] sm:$0x3]  ;;  %v676_v49 = vld [vmem:[#allocation0 + $0x288] sm:$0x3] }
  0xbf   :  { %975 = vst [vmem:[%s1373_s1 + $0xbe] sm:$0x3] %v760_v47  ;;  %960 = vst [vmem:[%s1373_s1 + $0xa0] sm:$0x3] %v670_v48  ;;  %v682_v50 = vld [vmem:[#allocation0 + $0x290] sm:$0x3] }
  0xc0   :  { %961 = vst [vmem:[%s1373_s1 + $0xa2] sm:$0x3] %v676_v49  ;;  %v688_v51 = vld [vmem:[#allocation0 + $0x298] sm:$0x3]  ;;  %v694_v52 = vld [vmem:[#allocation0 + $0x2a0] sm:$0x3] }
  0xc1   :  { %962 = vst [vmem:[%s1373_s1 + $0xa4] sm:$0x3] %v682_v50  ;;  %963 = vst [vmem:[%s1373_s1 + $0xa6] sm:$0x3] %v688_v51  ;;  %v700_v53 = vld [vmem:[#allocation0 + $0x2a8] sm:$0x3] }
  0xc2   :  { %964 = vst [vmem:[%s1373_s1 + $0xa8] sm:$0x3] %v694_v52  ;;  %v706_v54 = vld [vmem:[#allocation0 + $0x2b0] sm:$0x3]  ;;  %v712_v55 = vld [vmem:[#allocation0 + $0x2b8] sm:$0x3] }
  0xc3   :  { %965 = vst [vmem:[%s1373_s1 + $0xaa] sm:$0x3] %v700_v53  ;;  %966 = vst [vmem:[%s1373_s1 + $0xac] sm:$0x3] %v706_v54 }
  0xc4   :  { %967 = vst [vmem:[%s1373_s1 + $0xae] sm:$0x3] %v712_v55 }

// kernel: _distance_impl.1
= control target key start
LH: loop header
LB: loop body
LE: loop exit
PB: predicated region body
PF: predicated region fallthrough
CT: control target
= control target key end

     0   :  { %8 = vsyncpa [#allocation3], 0  ;;  %s1049_s0 = inlined_call_operand.vmem [shape: f32[2,768], index: 0, kind: input, shape index: {}]   ;;  %s1050_s1 = inlined_call_operand.hbm [shape: f32[896,256], index: 1, kind: input, shape index: {}]   ;;  %s1051_s2 = inlined_call_operand.vmem [shape: f32[2,256], index: 2, kind: input, shape index: {}]   ;;  %s1052_s3 = inlined_call_operand.hbm [shape: f32[1,128], index: 3, kind: output, shape index: {}]  }
   0x1   :  { %9 = vsyncpa [#allocation4], 0  ;;  %s956_s12 = smov [#allocation2]   ;;  %s908_s16 = scalar_lea.hbm %s1050_s1, 28672 }
   0x2   :  { %s17_s13 = sshll.u32 %s956_s12, 4  ;;  %p909_p0 = scmp.ne.s32.totalorder %s1050_s1, %s908_s16  ;;  %s18_s13 = int_to_ptr.vmem [resolvable:$true] %s17_s13 }
   0x3   :  { %p912_p1 = scmp.lt.u32.totalorder %s908_s16, %s1050_s1 }
   0x5   :  { %p914_p2 = pnand %p912_p1, %p909_p0 }
   0x7   :  { %917 = shalt.err (!%p914_p2)
}
   0x8   :  { %s918_s21 = scalar_lea.vmem %s18_s13, 28672  ;;  %p923_p4 = scmp.lt.s32.totalorder %s18_s13, %s18_s13 }
   0x9   :  { %p919_p3 = scmp.ne.s32.totalorder %s18_s13, %s918_s21  ;;  %p924_p5 = scmp.lt.s32.totalorder %s918_s21, %s918_s21 }
   0xb   :  { %p925_p6 = por %p924_p5, %p923_p4 }
   0xd   :  { %p926_p7 = pnand %p925_p6, %p919_p3 }
   0xf   :  { %929 = shalt.err (!%p926_p7)
}
  0x10   :  { %s957_s22 = smov 256   ;;  %s958_s23 = smov 16  }
  0x11   :  { %23 = dma.hbm_to_vmem [thread:$0]  %s1050_s1, 28672, %s18_s13, [#allocation3], %s957_s22, %s957_s22, %s958_s23  }
  0x12   :  { %952 = dma.done.wait [#allocation3], 28672  }
  0x13   :  { %953 = vsyncadd [#allocation3], 4294938624  ;;  %v96_v0 = vld [vmem:[#allocation2 + $0x208] sm:$0xff]  ;;  %v98_v1 = vld [vmem:[#allocation2 + $0x218] sm:$0xff]  ;;  %v242_v29 = vlaneseq  ;;  %v959_v30 = vmov 1983009808  }
  0x14   :  { %v95_v2 = vld [vmem:[#allocation2 + $0x200] sm:$0xff]  ;;  %v737_v3 = vpack.c.bf16 %v98_v1, %v96_v0  ;;  %v97_v4 = vld [vmem:[#allocation2 + $0x210] sm:$0xff]  ;;  %v100_v5 = vld [vmem:[#allocation2 + $0x228] sm:$0xff]  ;;  %v256_v31 = vunpack.c.l.s4 %v959_v30  ;;  %vm961_vm0 = vmmov 0   ;;  %vm582_vm1 = vcmask 1041408  }
  0x15   :  { %v102_v6 = vld [vmem:[#allocation2 + $0x238] sm:$0xff]  ;;  %v739_v7 = vpack.c.bf16 %v97_v4, %v95_v2  ;;  %v99_v9 = vld [vmem:[#allocation2 + $0x220] sm:$0xff]  ;;  %v101_v10 = vld [vmem:[#allocation2 + $0x230] sm:$0xff]  ;;  %v997_v38 = vshrl.u32 %v242_v29, 7  ;;  %vm584_vm2 = vcmask 1042432  }
  0x16   :  { %v741_v8 = vpack.c.bf16 %v102_v6, %v100_v5  ;;  %v104_v11 = vld [vmem:[#allocation2 + $0x248] sm:$0xff]  ;;  %738 = vmatprep.subr.bf16.mxu0 %v737_v3  ;;  %v106_v12 = vld [vmem:[#allocation2 + $0x258] sm:$0xff]  ;;  %v743_v13 = vpack.c.bf16 %v101_v10, %v99_v9  ;;  %v103_v15 = vld [vmem:[#allocation2 + $0x240] sm:$0xff]  ;;  %v257_v39 = vunpack.c.0.s8 %v256_v31 }
  0x17   :  { %740 = vmatpush1.bf16.msra.mxu0 %v739_v7  ;;  %v745_v14 = vpack.c.bf16 %v106_v12, %v104_v11  ;;  %v105_v16 = vld [vmem:[#allocation2 + $0x250] sm:$0xff]  ;;  %v108_v17 = vld [vmem:[#allocation2 + $0x268] sm:$0xff]  ;;  %v110_v18 = vld [vmem:[#allocation2 + $0x278] sm:$0xff] }
  0x18   :  { %742 = vmatprep.subr.bf16.mxu0 %v741_v8  ;;  %v747_v19 = vpack.c.bf16 %v105_v16, %v103_v15  ;;  %v749_v20 = vpack.c.bf16 %v110_v18, %v108_v17  ;;  %v107_v21 = vld [vmem:[#allocation2 + $0x260] sm:$0xff]  ;;  %v109_v22 = vld [vmem:[#allocation2 + $0x270] sm:$0xff]  ;;  %v112_v23 = vld [vmem:[#allocation2 + $0x288] sm:$0xff]  ;;  %v260_v50 = vsub.s32 %v257_v39, %v997_v38 }
  0x19   :  { %v114_v24 = vld [vmem:[#allocation2 + $0x298] sm:$0xff]  ;;  %v751_v25 = vpack.c.bf16 %v109_v22, %v107_v21  ;;  %v111_v27 = vld [vmem:[#allocation2 + $0x280] sm:$0xff]  ;;  %v113_v28 = vld [vmem:[#allocation2 + $0x290] sm:$0xff] }
  0x1a   :  { %v753_v26 = vpack.c.bf16 %v114_v24, %v112_v23  ;;  %v116_v32 = vld [vmem:[#allocation2 + $0x2a8] sm:$0xff]  ;;  %v118_v33 = vld [vmem:[#allocation2 + $0x2b8] sm:$0xff]  ;;  %v755_v34 = vpack.c.bf16 %v113_v28, %v111_v27  ;;  %v115_v36 = vld [vmem:[#allocation2 + $0x2a0] sm:$0xff] }
  0x1b   :  { %744 = vmatpush1.bf16.msra.mxu0 %v743_v13  ;;  %v757_v35 = vpack.c.bf16 %v118_v33, %v116_v32  ;;  %v117_v37 = vld [vmem:[#allocation2 + $0x2b0] sm:$0xff]  ;;  %v120_v40 = vld [vmem:[#allocation2 + $0x2c8] sm:$0xff]  ;;  %v122_v41 = vld [vmem:[#allocation2 + $0x2d8] sm:$0xff] }
  0x1c   :  { %746 = vmatprep.subr.bf16.mxu0 %v745_v14  ;;  %v759_v42 = vpack.c.bf16 %v117_v37, %v115_v36  ;;  %v119_v43 = vld [vmem:[#allocation2 + $0x2c0] sm:$0xff]  ;;  %v121_v44 = vld [vmem:[#allocation2 + $0x2d0] sm:$0xff]  ;;  %v32_v45 = vld [vmem:[#allocation2 + $0x8] sm:$0xff]  ;;  %v761_v46 = vpack.c.bf16 %v122_v41, %v120_v40 }
  0x1d   :  { %v124_v47 = vld [vmem:[#allocation2 + $0x2e8] sm:$0xff]  ;;  %v126_v48 = vld [vmem:[#allocation2 + $0x2f8] sm:$0xff]  ;;  %v31_v52 = vld [vmem:[#allocation2] sm:$0xff]  ;;  %v763_v59 = vpack.c.bf16 %v121_v44, %v119_v43 }
  0x1e   :  { %v34_v49 = vld [vmem:[#allocation2 + $0x18] sm:$0xff]  ;;  %v33_v53 = vld [vmem:[#allocation2 + $0x10] sm:$0xff]  ;;  %v29_v54 = vld [vmem:[%s1049_s0] sm:$0xff]  ;;  %v765_v63 = vpack.c.bf16 %v126_v48, %v124_v47 }
  0x1f   :  { %748 = vmatpush1.bf16.msra.mxu0 %v747_v19  ;;  %v673_v51 = vpack.c.bf16 %v34_v49, %v32_v45  ;;  %v675_v55 = vpack.c.bf16 %v33_v53, %v31_v52  ;;  %v254_v56 = vcombine.high %v29_v54, %v29_v54  ;;  %v36_v57 = vld [vmem:[#allocation2 + $0x28] sm:$0xff]  ;;  %v1003_v58 = vrot.slane %v29_v54, %v260_v50  ;;  %v123_v60 = vld [vmem:[#allocation2 + $0x2e0] sm:$0xff]  ;;  %v125_v61 = vld [vmem:[#allocation2 + $0x2f0] sm:$0xff] }
  0x20   :  { %750 = vmatprep.subr.bf16.mxu0 %v749_v20  ;;  %v38_v62 = vld [vmem:[#allocation2 + $0x38] sm:$0xff]  ;;  %v128_v0 = vld [vmem:[#allocation2 + $0x308] sm:$0xff]  ;;  %v35_v3 = vld [vmem:[#allocation2 + $0x20] sm:$0xff]  ;;  %v767_v13 = vpack.c.bf16 %v125_v61, %v123_v60 }
  0x21   :  { %674 = vmatprep.subr.bf16.mxu1 %v673_v51  ;;  %v1005_v1 = vrot.slane %v254_v56, %v260_v50  ;;  %v677_v2 = vpack.c.bf16 %v38_v62, %v36_v57  ;;  %v37_v4 = vld [vmem:[#allocation2 + $0x30] sm:$0xff]  ;;  %v130_v5 = vld [vmem:[#allocation2 + $0x318] sm:$0xff]  ;;  %v40_v7 = vld [vmem:[#allocation2 + $0x48] sm:$0xff]  ;;  %v269_v9 = vcombine.high %v1003_v58, %v1003_v58 }
  0x22   :  { %676 = vmatpush1.bf16.msra.mxu1 %v675_v55  ;;  %v679_v6 = vpack.c.bf16 %v37_v4, %v35_v3  ;;  %v42_v8 = vld [vmem:[#allocation2 + $0x58] sm:$0xff]  ;;  %v39_v12 = vld [vmem:[#allocation2 + $0x40] sm:$0xff]  ;;  %v41_v15 = vld [vmem:[#allocation2 + $0x50] sm:$0xff]  ;;  %v769_v16 = vpack.c.bf16 %v130_v5, %v128_v0 }
  0x23   :  { %752 = vmatpush1.bf16.msra.mxu0 %v751_v25  ;;  %v270_v10 = vcombine.high %v1005_v1, %v1005_v1  ;;  %678 = vmatprep.subr.bf16.mxu1 %v677_v2  ;;  %v681_v11 = vpack.c.bf16 %v42_v8, %v40_v7  ;;  %v127_v14 = vld [vmem:[#allocation2 + $0x300] sm:$0xff]  ;;  %v129_v17 = vld [vmem:[#allocation2 + $0x310] sm:$0xff]  ;;  %v44_v18 = vld [vmem:[#allocation2 + $0x68] sm:$0xff]  ;;  %v683_v22 = vpack.c.bf16 %v41_v15, %v39_v12 }
  0x24   :  { %754 = vmatprep.subr.bf16.mxu0 %v753_v26  ;;  %349 = vmatprep.mubr.f32.mxu1 %v269_v9  ;;  %v46_v19 = vld [vmem:[#allocation2 + $0x78] sm:$0xff]  ;;  %v132_v20 = vld [vmem:[#allocation2 + $0x328] sm:$0xff]  ;;  %v43_v24 = vld [vmem:[#allocation2 + $0x60] sm:$0xff]  ;;  %v771_v26 = vpack.c.bf16 %v129_v17, %v127_v14 }
  0x25   :  { %420 = vmatprep.mubr.f32.mxu0 %v270_v10  ;;  %v134_v21 = vld [vmem:[#allocation2 + $0x338] sm:$0xff]  ;;  %v685_v23 = vpack.c.bf16 %v46_v19, %v44_v18  ;;  %v45_v25 = vld [vmem:[#allocation2 + $0x70] sm:$0xff]  ;;  %v48_v27 = vld [vmem:[#allocation2 + $0x88] sm:$0xff] }
  0x26   :  { %680 = vmatpush1.bf16.msra.mxu1 %v679_v6  ;;  %v50_v28 = vld [vmem:[#allocation2 + $0x98] sm:$0xff]  ;;  %v773_v29 = vpack.c.bf16 %v134_v21, %v132_v20  ;;  %v131_v30 = vld [vmem:[#allocation2 + $0x320] sm:$0xff]  ;;  %v133_v31 = vld [vmem:[#allocation2 + $0x330] sm:$0xff] }
  0x27   :  { %756 = vmatpush1.bf16.msra.mxu0 %v755_v34  ;;  %682 = vmatprep.subr.bf16.mxu1 %v681_v11  ;;  %v136_v32 = vld [vmem:[#allocation2 + $0x348] sm:$0xff]  ;;  %v138_v33 = vld [vmem:[#allocation2 + $0x358] sm:$0xff]  ;;  %v687_v34 = vpack.c.bf16 %v45_v25, %v43_v24  ;;  %v47_v36 = vld [vmem:[#allocation2 + $0x80] sm:$0xff]  ;;  %v775_v39 = vpack.c.bf16 %v133_v31, %v131_v30 }
  0x28   :  { %758 = vmatprep.subr.bf16.mxu0 %v757_v35  ;;  %v689_v35 = vpack.c.bf16 %v50_v28, %v48_v27  ;;  %v49_v37 = vld [vmem:[#allocation2 + $0x90] sm:$0xff]  ;;  %v52_v40 = vld [vmem:[#allocation2 + $0xa8] sm:$0xff]  ;;  %v54_v41 = vld [vmem:[#allocation2 + $0xb8] sm:$0xff] }
  0x29   :  { %v135_v43 = vld [vmem:[#allocation2 + $0x340] sm:$0xff]  ;;  %v137_v44 = vld [vmem:[#allocation2 + $0x350] sm:$0xff]  ;;  %v140_v45 = vld [vmem:[#allocation2 + $0x368] sm:$0xff]  ;;  %v691_v47 = vpack.c.bf16 %v49_v37, %v47_v36  ;;  %v693_v48 = vpack.c.bf16 %v54_v41, %v52_v40 }
  0x2a   :  { %684 = vmatpush1.bf16.msra.mxu1 %v683_v22  ;;  %v51_v49 = vld [vmem:[#allocation2 + $0xa0] sm:$0xff]  ;;  %v53_v50 = vld [vmem:[#allocation2 + $0xb0] sm:$0xff]  ;;  %v779_v51 = vpack.c.bf16 %v137_v44, %v135_v43  ;;  %v56_v52 = vld [vmem:[#allocation2 + $0xc8] sm:$0xff] }
  0x2b   :  { %760 = vmatpush1.bf16.msra.mxu0 %v759_v42  ;;  %686 = vmatprep.subr.bf16.mxu1 %v685_v23  ;;  %v777_v42 = vpack.c.bf16 %v138_v33, %v136_v32  ;;  %v58_v53 = vld [vmem:[#allocation2 + $0xd8] sm:$0xff]  ;;  %v139_v55 = vld [vmem:[#allocation2 + $0x360] sm:$0xff]  ;;  %v141_v56 = vld [vmem:[#allocation2 + $0x370] sm:$0xff]  ;;  %v695_v60 = vpack.c.bf16 %v53_v50, %v51_v49 }
  0x2c   :  { %762 = vmatprep.subr.bf16.mxu0 %v761_v46  ;;  %v142_v46 = vld [vmem:[#allocation2 + $0x378] sm:$0xff]  ;;  %v144_v57 = vld [vmem:[#allocation2 + $0x388] sm:$0xff]  ;;  %v697_v61 = vpack.c.bf16 %v58_v53, %v56_v52  ;;  %v55_v62 = vld [vmem:[#allocation2 + $0xc0] sm:$0xff]  ;;  %v783_v0 = vpack.c.bf16 %v141_v56, %v139_v55 }
  0x2d   :  { %v781_v54 = vpack.c.bf16 %v142_v46, %v140_v45  ;;  %v60_v2 = vld [vmem:[#allocation2 + $0xe8] sm:$0xff]  ;;  %v62_v3 = vld [vmem:[#allocation2 + $0xf8] sm:$0xff]  ;;  %v143_v5 = vld [vmem:[#allocation2 + $0x380] sm:$0xff] }
  0x2e   :  { %688 = vmatpush1.bf16.msra.mxu1 %v687_v34  ;;  %v145_v6 = vld [vmem:[#allocation2 + $0x390] sm:$0xff]  ;;  %v148_v7 = vld [vmem:[#allocation2 + $0x3a8] sm:$0xff]  ;;  %v150_v8 = vld [vmem:[#allocation2 + $0x3b8] sm:$0xff]  ;;  %v701_v10 = vpack.c.bf16 %v62_v3, %v60_v2 }
  0x2f   :  { %764 = vmatpush1.bf16.msra.mxu0 %v763_v59  ;;  %690 = vmatprep.subr.bf16.mxu1 %v689_v35  ;;  %v146_v59 = vld [vmem:[#allocation2 + $0x398] sm:$0xff]  ;;  %v59_v11 = vld [vmem:[#allocation2 + $0xe0] sm:$0xff]  ;;  %v61_v12 = vld [vmem:[#allocation2 + $0xf0] sm:$0xff] }
  0x30   :  { %766 = vmatprep.subr.bf16.mxu0 %v765_v63  ;;  %v57_v63 = vld [vmem:[#allocation2 + $0xd0] sm:$0xff]  ;;  %v785_v4 = vpack.c.bf16 %v146_v59, %v144_v57  ;;  %v64_v14 = vld [vmem:[#allocation2 + $0x108] sm:$0xff]  ;;  %v66_v15 = vld [vmem:[#allocation2 + $0x118] sm:$0xff]  ;;  %v703_v21 = vpack.c.bf16 %v61_v12, %v59_v11 }
  0x31   :  { %v699_v9 = vpack.c.bf16 %v57_v63, %v55_v62  ;;  %v147_v17 = vld [vmem:[#allocation2 + $0x3a0] sm:$0xff]  ;;  %v149_v18 = vld [vmem:[#allocation2 + $0x3b0] sm:$0xff]  ;;  %v152_v19 = vld [vmem:[#allocation2 + $0x3c8] sm:$0xff]  ;;  %v705_v22 = vpack.c.bf16 %v66_v15, %v64_v14 }
  0x32   :  { %692 = vmatpush1.bf16.msra.mxu1 %v691_v47  ;;  %v154_v20 = vld [vmem:[#allocation2 + $0x3d8] sm:$0xff]  ;;  %v63_v23 = vld [vmem:[#allocation2 + $0x100] sm:$0xff]  ;;  %v65_v24 = vld [vmem:[#allocation2 + $0x110] sm:$0xff]  ;;  %v791_v25 = vpack.c.bf16 %v149_v18, %v147_v17 }
  0x33   :  { %768 = vmatpush1.bf16.msra.mxu0 %v767_v13  ;;  %694 = vmatprep.subr.bf16.mxu1 %v693_v48  ;;  %v787_v13 = vpack.c.bf16 %v145_v6, %v143_v5  ;;  %v70_v27 = vld [vmem:[#allocation2 + $0x138] sm:$0xff]  ;;  %v793_v28 = vpack.c.bf16 %v154_v20, %v152_v19  ;;  %v153_v30 = vld [vmem:[#allocation2 + $0x3d0] sm:$0xff]  ;;  %v156_v31 = vld [vmem:[#allocation2 + $0x3e8] sm:$0xff]  ;;  %v707_v33 = vpack.c.bf16 %v65_v24, %v63_v23 }
  0x34   :  { %770 = vmatprep.subr.bf16.mxu0 %v769_v16  ;;  %v789_v16 = vpack.c.bf16 %v150_v8, %v148_v7  ;;  %v158_v32 = vld [vmem:[#allocation2 + $0x3f8] sm:$0xff]  ;;  %v67_v35 = vld [vmem:[#allocation2 + $0x120] sm:$0xff]  ;;  %v69_v36 = vld [vmem:[#allocation2 + $0x130] sm:$0xff] }
  0x35   :  { %v74_v40 = vld [vmem:[#allocation2 + $0x158] sm:$0xff]  ;;  %v797_v41 = vpack.c.bf16 %v158_v32, %v156_v31  ;;  %v157_v43 = vld [vmem:[#allocation2 + $0x3f0] sm:$0xff]  ;;  %v160_v44 = vld [vmem:[#allocation2 + $0x408] sm:$0xff]  ;;  %v711_v46 = vpack.c.bf16 %v69_v36, %v67_v35 }
  0x36   :  { %696 = vmatpush1.bf16.msra.mxu1 %v695_v60  ;;  %v162_v45 = vld [vmem:[#allocation2 + $0x418] sm:$0xff]  ;;  %v71_v48 = vld [vmem:[#allocation2 + $0x140] sm:$0xff]  ;;  %v73_v49 = vld [vmem:[#allocation2 + $0x150] sm:$0xff] }
  0x37   :  { %772 = vmatpush1.bf16.msra.mxu0 %v771_v26  ;;  %698 = vmatprep.subr.bf16.mxu1 %v697_v61  ;;  %v68_v26 = vld [vmem:[#allocation2 + $0x128] sm:$0xff]  ;;  %v78_v52 = vld [vmem:[#allocation2 + $0x178] sm:$0xff]  ;;  %v801_v53 = vpack.c.bf16 %v162_v45, %v160_v44  ;;  %v161_v55 = vld [vmem:[#allocation2 + $0x410] sm:$0xff]  ;;  %v715_v59 = vpack.c.bf16 %v73_v49, %v71_v48 }
  0x38   :  { %774 = vmatprep.subr.bf16.mxu0 %v773_v29  ;;  %v151_v29 = vld [vmem:[#allocation2 + $0x3c0] sm:$0xff]  ;;  %v709_v34 = vpack.c.bf16 %v70_v27, %v68_v26  ;;  %v164_v56 = vld [vmem:[#allocation2 + $0x428] sm:$0xff]  ;;  %v166_v57 = vld [vmem:[#allocation2 + $0x438] sm:$0xff] }
  0x39   :  { %v795_v37 = vpack.c.bf16 %v153_v30, %v151_v29  ;;  %v75_v61 = vld [vmem:[#allocation2 + $0x160] sm:$0xff]  ;;  %v77_v62 = vld [vmem:[#allocation2 + $0x170] sm:$0xff]  ;;  %v82_v2 = vld [vmem:[#allocation2 + $0x198] sm:$0xff] }
  0x3a   :  { %700 = vmatpush1.bf16.msra.mxu1 %v699_v9  ;;  %v1014_v3 = vld.sshfl [vmem:[%s1049_s0 + $0x8] sm:$0x33 pattern:$0x76325410]  ;;  %v163_v5 = vld [vmem:[#allocation2 + $0x420] sm:$0xff]  ;;  %v165_v6 = vld [vmem:[#allocation2 + $0x430] sm:$0xff] }
  0x3b   :  { %776 = vmatpush1.bf16.msra.mxu0 %v775_v39  ;;  %702 = vmatprep.subr.bf16.mxu1 %v701_v10  ;;  %v72_v39 = vld [vmem:[#allocation2 + $0x148] sm:$0xff]  ;;  %v278_v7 = vcombine.high %v1014_v3, %v1014_v3  ;;  %v170_v9 = vld [vmem:[#allocation2 + $0x458] sm:$0xff]  ;;  %v719_v10 = vpack.c.bf16 %v77_v62, %v75_v61  ;;  %v79_v12 = vld [vmem:[#allocation2 + $0x180] sm:$0xff]  ;;  %v807_v14 = vpack.c.bf16 %v165_v6, %v163_v5  ;;  %v960_v5 = vmov 0.0|0.0  }
  0x3c   :  { %778 = vmatprep.subr.bf16.mxu0 %v777_v42  ;;  %v155_v42 = vld [vmem:[#allocation2 + $0x3e0] sm:$0xff]  ;;  %v713_v47 = vpack.c.bf16 %v74_v40, %v72_v39  ;;  %v168_v8 = vld [vmem:[#allocation2 + $0x448] sm:$0xff]  ;;  %v169_v19 = vld [vmem:[#allocation2 + $0x450] sm:$0xff] }
  0x3d   :  { %v799_v50 = vpack.c.bf16 %v157_v43, %v155_v42  ;;  %v84_v15 = vld [vmem:[#allocation2 + $0x1a8] sm:$0xff]  ;;  %v809_v17 = vpack.c.bf16 %v170_v9, %v168_v8  ;;  %v167_v18 = vld [vmem:[#allocation2 + $0x440] sm:$0xff]  ;;  %v85_v24 = vld [vmem:[#allocation2 + $0x1b0] sm:$0xff] }
  0x3e   :  { %704 = vmatpush1.bf16.msra.mxu1 %v703_v21  ;;  %v172_v20 = vld [vmem:[#allocation2 + $0x468] sm:$0xff]  ;;  %v174_v21 = vld [vmem:[#allocation2 + $0x478] sm:$0xff]  ;;  %v171_v29 = vld [vmem:[#allocation2 + $0x460] sm:$0xff] }
  0x3f   :  { %780 = vmatpush1.bf16.msra.mxu0 %v779_v51  ;;  %706 = vmatprep.subr.bf16.mxu1 %v705_v22  ;;  %v76_v51 = vld [vmem:[#allocation2 + $0x168] sm:$0xff]  ;;  %v90_v27 = vld [vmem:[#allocation2 + $0x1d8] sm:$0xff]  ;;  %v173_v30 = vld [vmem:[#allocation2 + $0x470] sm:$0xff] }
  0x40   :  { %782 = vmatprep.subr.bf16.mxu0 %v781_v54  ;;  %v159_v54 = vld [vmem:[#allocation2 + $0x400] sm:$0xff]  ;;  %v717_v60 = vpack.c.bf16 %v78_v52, %v76_v51  ;;  %v88_v26 = vld [vmem:[#allocation2 + $0x1c8] sm:$0xff]  ;;  %v178_v32 = vld [vmem:[#allocation2 + $0x498] sm:$0xff] }
  0x41   :  { %v803_v63 = vpack.c.bf16 %v161_v55, %v159_v54  ;;  %v176_v31 = vld [vmem:[#allocation2 + $0x488] sm:$0xff]  ;;  %v87_v35 = vld [vmem:[#allocation2 + $0x1c0] sm:$0xff]  ;;  %v89_v36 = vld [vmem:[#allocation2 + $0x1d0] sm:$0xff] }
  0x42   :  { %708 = vmatpush1.bf16.msra.mxu1 %v707_v33  ;;  %v92_v39 = vld [vmem:[#allocation2 + $0x1e8] sm:$0xff]  ;;  %v94_v40 = vld [vmem:[#allocation2 + $0x1f8] sm:$0xff]  ;;  %v175_v42 = vld [vmem:[#allocation2 + $0x480] sm:$0xff] }
  0x43   :  { %784 = vmatpush1.bf16.msra.mxu0 %v783_v0  ;;  %710 = vmatprep.subr.bf16.mxu1 %v709_v34  ;;  %v80_v0 = vld [vmem:[#allocation2 + $0x188] sm:$0xff]  ;;  %v729_v34 = vpack.c.bf16 %v90_v27, %v88_v26  ;;  %v177_v43 = vld [vmem:[#allocation2 + $0x490] sm:$0xff]  ;;  %v182_v45 = vld [vmem:[#allocation2 + $0x4b8] sm:$0xff] }
  0x44   :  { %786 = vmatprep.subr.bf16.mxu0 %v785_v4  ;;  %v805_v4 = vpack.c.bf16 %v166_v57, %v164_v56  ;;  %v721_v11 = vpack.c.bf16 %v82_v2, %v80_v0  ;;  %v180_v44 = vld [vmem:[#allocation2 + $0x4a8] sm:$0xff]  ;;  %v91_v48 = vld [vmem:[#allocation2 + $0x1e0] sm:$0xff]  ;;  %v93_v49 = vld [vmem:[#allocation2 + $0x1f0] sm:$0xff] }
  0x45   :  { %v821_v51 = vpack.c.bf16 %v182_v45, %v180_v44  ;;  %v179_v52 = vld [vmem:[#allocation2 + $0x4a0] sm:$0xff]  ;;  %v184_v54 = vld [vmem:[#allocation2 + $0x4c8] sm:$0xff]  ;;  %v186_v55 = vld [vmem:[#allocation2 + $0x4d8] sm:$0xff]  ;;  %v735_v56 = vpack.c.bf16 %v93_v49, %v91_v48 }
  0x46   :  { %712 = vmatpush1.bf16.msra.mxu1 %v711_v46  ;;  %v731_v46 = vpack.c.bf16 %v89_v36, %v87_v35  ;;  %v223_v57 = vld [vmem:[#allocation2 + $0x600] sm:$0xff]  ;;  %v825_v61 = vpack.c.bf16 %v186_v55, %v184_v54  ;;  %v188_v0 = vld [vmem:[#allocation2 + $0x4e8] sm:$0xff]  ;;  %v190_v2 = vld [vmem:[#allocation2 + $0x4f8] sm:$0xff] }
  0x47   :  { %788 = vmatpush1.bf16.msra.mxu0 %v787_v13  ;;  %714 = vmatprep.subr.bf16.mxu1 %v713_v47  ;;  %v81_v13 = vld [vmem:[#allocation2 + $0x190] sm:$0xff]  ;;  %v733_v47 = vpack.c.bf16 %v94_v40, %v92_v39  ;;  %v183_v62 = vld [vmem:[#allocation2 + $0x4c0] sm:$0xff]  ;;  %v829_v9 = vpack.c.bf16 %v190_v2, %v188_v0  ;;  %v206_v39 = vld [vmem:[#allocation2 + $0x578] sm:$0xff] }
  0x48   :  { %790 = vmatprep.subr.bf16.mxu0 %v789_v16  ;;  %v86_v16 = vld [vmem:[#allocation2 + $0x1b8] sm:$0xff]  ;;  %v723_v22 = vpack.c.bf16 %v81_v13, %v79_v12  ;;  %v225_v6 = vld [vmem:[#allocation2 + $0x620] sm:$0xff]  ;;  %v192_v12 = vld [vmem:[#allocation2 + $0x508] sm:$0xff] }
  0x49   :  { %v725_v23 = vpack.c.bf16 %v86_v16, %v84_v15  ;;  %v194_v13 = vld [vmem:[#allocation2 + $0x518] sm:$0xff]  ;;  %v227_v15 = vld [vmem:[#allocation2 + $0x640] sm:$0xff]  ;;  %v228_v16 = vld [vmem:[#allocation2 + $0x650] sm:$0xff] }
  0x4a   :  { %716 = vmatpush1.bf16.msra.mxu1 %v715_v59  ;;  %v224_v59 = vld [vmem:[#allocation2 + $0x610] sm:$0xff]  ;;  %v195_v26 = vld [vmem:[#allocation2 + $0x520] sm:$0xff]  ;;  %v210_v48 = vld [vmem:[#allocation2 + $0x598] sm:$0xff] }
  0x4b   :  { %792 = vmatpush1.bf16.msra.mxu0 %v791_v25  ;;  %718 = vmatprep.subr.bf16.mxu1 %v717_v60  ;;  %v811_v25 = vpack.c.bf16 %v169_v19, %v167_v18  ;;  %v833_v18 = vpack.c.bf16 %v194_v13, %v192_v12  ;;  %v191_v19 = vld [vmem:[#allocation2 + $0x500] sm:$0xff]  ;;  %v197_v27 = vld [vmem:[#allocation2 + $0x530] sm:$0xff]  ;;  %v212_v54 = vld [vmem:[#allocation2 + $0x5a8] sm:$0xff] }
  0x4c   :  { %794 = vmatprep.subr.bf16.mxu0 %v793_v28  ;;  %v813_v28 = vpack.c.bf16 %v174_v21, %v172_v20  ;;  %v193_v20 = vld [vmem:[#allocation2 + $0x510] sm:$0xff]  ;;  %v196_v21 = vld [vmem:[#allocation2 + $0x528] sm:$0xff]  ;;  %v199_v35 = vld [vmem:[#allocation2 + $0x540] sm:$0xff] }
  0x4d   :  { %v201_v36 = vld [vmem:[#allocation2 + $0x550] sm:$0xff]  ;;  %v203_v45 = vld [vmem:[#allocation2 + $0x560] sm:$0xff]  ;;  %v214_v55 = vld [vmem:[#allocation2 + $0x5b8] sm:$0xff] }
  0x4e   :  { %720 = vmatpush1.bf16.msra.mxu1 %v719_v10  ;;  %v187_v10 = vld [vmem:[#allocation2 + $0x4e0] sm:$0xff] }
  0x4f   :  { %796 = vmatpush1.bf16.msra.mxu0 %v795_v37  ;;  %722 = vmatprep.subr.bf16.mxu1 %v721_v11  ;;  %v815_v37 = vpack.c.bf16 %v173_v30, %v171_v29  ;;  %v189_v11 = vld [vmem:[#allocation2 + $0x4f0] sm:$0xff]  ;;  %v202_v29 = vld [vmem:[#allocation2 + $0x558] sm:$0xff]  ;;  %v215_v2 = vld [vmem:[#allocation2 + $0x5c0] sm:$0xff] }
  0x50   :  { %798 = vmatprep.subr.bf16.mxu0 %v797_v41  ;;  %v817_v41 = vpack.c.bf16 %v178_v32, %v176_v31  ;;  %v231_v31 = vld [vmem:[#allocation2 + $0x680] sm:$0xff]  ;;  %v232_v32 = vld [vmem:[#allocation2 + $0x690] sm:$0xff] }
  0x51   :  { %v878_v40 = vpack.c.bf16 %v232_v32, %v231_v31  ;;  %v235_v13 = vld [vmem:[#allocation2 + $0x6c0] sm:$0xff] }
  0x52   :  { %724 = vmatpush1.bf16.msra.mxu1 %v723_v22  ;;  %v198_v22 = vld [vmem:[#allocation2 + $0x538] sm:$0xff] }
  0x53   :  { %800 = vmatpush1.bf16.msra.mxu0 %v799_v50  ;;  %726 = vmatprep.subr.bf16.mxu1 %v725_v23  ;;  %v819_v50 = vpack.c.bf16 %v177_v43, %v175_v42  ;;  %v872_v23 = vpack.c.bf16 %v228_v16, %v227_v15  ;;  %v234_v42 = vld [vmem:[#allocation2 + $0x6b0] sm:$0xff]  ;;  %v843_v43 = vpack.c.bf16 %v201_v36, %v199_v35  ;;  %v237_v16 = vld [vmem:[#allocation2 + $0x6e0] sm:$0xff] }
  0x54   :  { %802 = vmatprep.subr.bf16.mxu0 %v801_v53  ;;  %v181_v53 = vld [vmem:[#allocation2 + $0x4b0] sm:$0xff] }
  0x55   :  { %v823_v60 = vpack.c.bf16 %v181_v53, %v179_v52  ;;  %v207_v52 = vld [vmem:[#allocation2 + $0x580] sm:$0xff]  ;;  %v209_v53 = vld [vmem:[#allocation2 + $0x590] sm:$0xff] }
  0x56   :  { %421 = vmatmul.mubr.f32.vlgmr.msra.gmra.mrb[0].mxu0 %v1005_v1  ;;  %v83_v1 = vld [vmem:[#allocation2 + $0x1a0] sm:$0xff] }
  0x57   :  { %804 = vmatpush1.bf16.msra.mxu0 %v803_v63  ;;  %491 = vmatprep.mubr.f32.mxu0 %v278_v7  ;;  %v727_v33 = vpack.c.bf16 %v85_v24, %v83_v1  ;;  %v185_v63 = vld [vmem:[#allocation2 + $0x4d0] sm:$0xff]  ;;  %v835_v24 = vpack.c.bf16 %v193_v20, %v191_v19  ;;  %v962_v19 = vmov 0.0  }
  0x58   :  { %806 = vmatprep.subr.bf16.mxu0 %v805_v4  ;;  %v866_v4 = vpack.c.bf16 %v224_v59, %v223_v57  ;;  %v226_v7 = vld [vmem:[#allocation2 + $0x630] sm:$0xff]  ;;  %v827_v8 = vpack.c.bf16 %v185_v63, %v183_v62  ;;  %v853_v57 = vpack.c.bf16 %v214_v55, %v212_v54  ;;  %v211_v59 = vld [vmem:[#allocation2 + $0x5a0] sm:$0xff]  ;;  %v218_v62 = vld [vmem:[#allocation2 + $0x5d8] sm:$0xff] }
  0x59   :  { %728 = vmatpush1.bf16.msra.mxu1 %v727_v33  ;;  %v230_v1 = vld [vmem:[#allocation2 + $0x670] sm:$0xff]  ;;  %v839_v33 = vpack.c.bf16 %v197_v27, %v195_v26 }
  0x5a   :  { %730 = vmatprep.subr.bf16.mxu1 %v729_v34 }
  0x5b   :  { %808 = vmatpush1.bf16.msra.mxu0 %v807_v14  ;;  %v869_v14 = vpack.c.bf16 %v226_v7, %v225_v6  ;;  %v220_v6 = vld [vmem:[#allocation2 + $0x5e8] sm:$0xff]  ;;  %v222_v7 = vld [vmem:[#allocation2 + $0x5f8] sm:$0xff] }
  0x5c   :  { %810 = vmatprep.subr.bf16.mxu0 %v809_v17  ;;  %v831_v17 = vpack.c.bf16 %v189_v11, %v187_v10  ;;  %v219_v10 = vld [vmem:[#allocation2 + $0x5e0] sm:$0xff]  ;;  %v221_v11 = vld [vmem:[#allocation2 + $0x5f0] sm:$0xff] }
  0x5d   :  { %732 = vmatpush1.bf16.msra.mxu1 %v731_v46  ;;  %v205_v46 = vld [vmem:[#allocation2 + $0x570] sm:$0xff]  ;;  %v863_v12 = vpack.c.bf16 %v221_v11, %v219_v10 }
  0x5e   :  { %734 = vmatprep.subr.bf16.mxu1 %v733_v47  ;;  %v208_v47 = vld [vmem:[#allocation2 + $0x588] sm:$0xff] }
  0x5f   :  { %812 = vmatpush1.bf16.msra.mxu0 %v811_v25  ;;  %v837_v25 = vpack.c.bf16 %v198_v22, %v196_v21  ;;  %v244_v22 = vsub.s32 0, %v997_v38 }
  0x60   :  { %814 = vmatprep.subr.bf16.mxu0 %v813_v28  ;;  %v200_v28 = vld [vmem:[#allocation2 + $0x548] sm:$0xff] }
  0x61   :  { %736 = vmatpush1.bf16.msra.mxu1 %v735_v56  ;;  %v841_v34 = vpack.c.bf16 %v202_v29, %v200_v28  ;;  %v851_v56 = vpack.c.bf16 %v209_v53, %v207_v52 }
  0x62   :  { %865 = vmatprep.subr.bf16.mxu1 %v960_v5 }
  0x63   :  { %816 = vmatpush1.bf16.msra.mxu0 %v815_v37  ;;  %v204_v37 = vld [vmem:[#allocation2 + $0x568] sm:$0xff] }
  0x64   :  { %818 = vmatprep.subr.bf16.mxu0 %v817_v41  ;;  %350 = vmatmul.mubr.f32.vlgmr.msra.gmra.mrb[0].mxu1 %v1003_v58  ;;  %v229_v58 = vld [vmem:[#allocation2 + $0x660] sm:$0xff]  ;;  %v845_v44 = vpack.c.bf16 %v206_v39, %v204_v37 }
  0x65   :  { %867 = vmatpush3.bf16.msra.mxu1 %v866_v4  ;;  %v875_v30 = vpack.c.bf16 %v230_v1, %v229_v58  ;;  %v233_v41 = vld [vmem:[#allocation2 + $0x6a0] sm:$0xff]  ;;  %v217_v4 = vld [vmem:[#allocation2 + $0x5d0] sm:$0xff]  ;;  %670 = vmatprep.mubr.msk.f32.mxu1 %vm961_vm0, %v962_v19 }
  0x66   :  { %868 = vmatprep.subr.bf16.mxu1 %v960_v5  ;;  %v881_v49 = vpack.c.bf16 %v234_v42, %v233_v41  ;;  %v963_v41 = vmov 0  }
  0x67   :  { %820 = vmatpush1.bf16.msra.mxu0 %v819_v50  ;;  %v847_v50 = vpack.c.bf16 %v205_v46, %v203_v45  ;;  %904 = vset.pattern.permute.xlu0 %v963_v41 }
  0x68   :  { %822 = vmatprep.subr.bf16.mxu0 %v821_v51  ;;  %v849_v51 = vpack.c.bf16 %v210_v48, %v208_v47 }
  0x69   :  { %870 = vmatpush3.bf16.msra.mxu1 %v869_v14  ;;  %v236_v14 = vld [vmem:[#allocation2 + $0x6d0] sm:$0xff] }
  0x6a   :  { %871 = vmatprep.subr.bf16.mxu1 %v960_v5  ;;  %v884_v15 = vpack.c.bf16 %v236_v14, %v235_v13 }
  0x6b   :  { %824 = vmatpush1.bf16.msra.mxu0 %v823_v60  ;;  %v213_v60 = vld [vmem:[#allocation2 + $0x5b0] sm:$0xff] }
  0x6c   :  { %826 = vmatprep.subr.bf16.mxu0 %v825_v61  ;;  %v216_v61 = vld [vmem:[#allocation2 + $0x5c8] sm:$0xff]  ;;  %v855_v63 = vpack.c.bf16 %v213_v60, %v211_v59 }
  0x6d   :  { %873 = vmatpush3.bf16.msra.mxu1 %v872_v23  ;;  %v857_v0 = vpack.c.bf16 %v218_v62, %v216_v61  ;;  %v248_v23 = vsub.s32 1, %v997_v38 }
  0x6e   :  { %874 = vmatprep.subr.bf16.mxu1 %v960_v5 }
  0x6f   :  { %828 = vmatpush1.bf16.msra.mxu0 %v827_v8  ;;  %v859_v8 = vpack.c.bf16 %v217_v4, %v215_v2 }
  0x70   :  { %830 = vmatprep.subr.bf16.mxu0 %v829_v9  ;;  %v861_v9 = vpack.c.bf16 %v222_v7, %v220_v6 }
  0x71   :  { %876 = vmatpush3.bf16.msra.mxu1 %v875_v30  ;;  %v620_v30 = vld [vmem:[%s1051_s2 + $0x1] ss:$0 sm:$0xff] }
  0x72   :  { %877 = vmatprep.subr.bf16.mxu1 %v960_v5 }
  0x73   :  { %832 = vmatpush1.bf16.msra.mxu0 %v831_v17  ;;  %v238_v17 = vld [vmem:[#allocation2 + $0x6f0] sm:$0xff] }
  0x74   :  { %834 = vmatprep.subr.bf16.mxu0 %v833_v18  ;;  %v887_v18 = vpack.c.bf16 %v238_v17, %v237_v16 }
  0x75   :  { %879 = vmatpush3.bf16.msra.mxu1 %v878_v40 }
  0x76   :  { %880 = vmatprep.subr.bf16.mxu1 %v960_v5 }
  0x77   :  { %836 = vmatpush1.bf16.msra.mxu0 %v835_v24 }
  0x78   :  { %838 = vmatprep.subr.bf16.mxu0 %v837_v25 }
  0x79   :  { %882 = vmatpush3.bf16.msra.mxu1 %v881_v49 }
  0x7a   :  { %883 = vmatprep.subr.bf16.mxu1 %v960_v5 }
  0x7b   :  { %840 = vmatpush1.bf16.msra.mxu0 %v839_v33 }
  0x7c   :  { %842 = vmatprep.subr.bf16.mxu0 %v841_v34 }
  0x7d   :  { %885 = vmatpush3.bf16.msra.mxu1 %v884_v15 }
  0x7e   :  { %886 = vmatprep.subr.bf16.mxu1 %v960_v5 }
  0x7f   :  { %844 = vmatpush1.bf16.msra.mxu0 %v843_v43 }
  0x80   :  { %846 = vmatprep.subr.bf16.mxu0 %v845_v44 }
  0x81   :  { %888 = vmatpush3.bf16.msra.mxu1 %v887_v18 }
  0x83   :  { %848 = vmatpush1.bf16.msra.mxu0 %v847_v50 }
  0x84   :  { %850 = vmatprep.subr.bf16.mxu0 %v849_v51 }
  0x87   :  { %852 = vmatpush1.bf16.msra.mxu0 %v851_v56 }
  0x88   :  { %854 = vmatprep.subr.bf16.mxu0 %v853_v57 }
  0x8b   :  { %856 = vmatpush1.bf16.msra.mxu0 %v855_v63 }
  0x8c   :  { %858 = vmatprep.subr.bf16.mxu0 %v857_v0 }
  0x8f   :  { %860 = vmatpush1.bf16.msra.mxu0 %v859_v8 }
  0x90   :  { %862 = vmatprep.subr.bf16.mxu0 %v861_v9 }
  0x93   :  { %864 = vmatpush1.bf16.msra.mxu0 %v863_v12 }
  0x96   :  { %492 = vmatmul.mubr.f32.vlgmr.msra.gmra.mrb[0].mxu0 %v1014_v3  ;;  %v239_v3 = vld [vmem:[%s1051_s2] ss:$2 sm:$0x3]  ;;  %s964_s2 = smov [#allocation5]  }
  0x97   :  { %v245_v58 = vrot.slane %v239_v3, %v244_v22  ;;  %v249_v1 = vrot.slane %v239_v3, %v248_v23  ;;  %s610_s5 = sshll.u32 %s964_s2, 4  ;;  %s611_s5 = int_to_ptr.vmem [resolvable:$true] %s610_s5 }
  0x98   :  { %s930_s6 = scalar_lea.vmem %s611_s5, 16  ;;  %s934_s7 = scalar_lea.vmem %s611_s5, 32 }
  0x99   :  { %p931_p8 = scmp.ne.s32.totalorder %s611_s5, %s930_s6  ;;  %p935_p9 = scmp.lt.s32.totalorder %s611_s5, %s611_s5 }
  0x9a   :  { %p936_p10 = scmp.lt.s32.totalorder %s934_s7, %s930_s6 }
  0x9c   :  { %p937_p11 = por %p936_p10, %p935_p9 }
  0x9e   :  { %p938_p12 = pnand %p937_p11, %p931_p8 }
 0x137   :  { %v351_v20 = vpop.f32.mrb[0].mxu1 }
 0x138   :  { %v353_v21 = vpop.f32.mrb[1].mxu1  ;;  %v352_v5 = vadd.f32 %v351_v20, %v245_v58 }
 0x139   :  { %v354_v24 = vadd.f32 %v353_v21, %v249_v1 }
 0x169   :  { %v493_v25 = vpop.f32.mrb[0].mxu0 }
 0x16a   :  { %v890_v26 = vadd.f32 %v493_v25, %v352_v5  ;;  %v495_v27 = vpop.f32.mrb[1].mxu0 }
 0x16b   :  { %v892_v28 = vadd.f32 %v495_v27, %v354_v24 }
 0x16d   :  { %v498_v29 = vmax.f32 %v892_v28, 0.0 }
 0x16f   :  { %671 = vmatmul.mubr.f32.vlgmr.msra.gmra.mrb[2].mxu1 %v498_v29 }
 0x242   :  { %v569_v31 = vpop.f32.mrb[2].mxu1 }
 0x243   :  { %v570_v32 = vadd.f32 %v620_v30, %v569_v31  ;;  %v672_v33 = vpop.f32.mrb[3].mxu1 }
 0x245   :  { %v573_v34 = vadd.f32 %v890_v26, %v570_v32 }
 0x247   :  { %v576_v35 = vrot.slane %v573_v34, 1  ;;  %v574_v36 = vmul.f32 %v573_v34, %v573_v34 }
 0x249   :  { %v578_v38 = vmul.f32 %v576_v35, %v573_v34 }
 0x24b   :  { %v580_v37 = vrot.slane %v578_v38, 6 }
 0x24d   :  { %v583_v39 = vsel %vm582_vm1, %v574_v36, %v580_v37 }
 0x24e   :  { %v585_v40 = vsel %vm584_vm2, %v583_v39, 0.0 }
 0x24f   :  { %586 = vadd.xlane.f32.xlu0 %v585_v40 }
 0x2dc   :  { %v587_v42 = vpop.xlane.xlu0 %586 }
 0x2dd   :  { %v588_v43 = vmax.f32 %v587_v42, 1e-16 }
 0x2df   :  { %906 = vrsqrt.f32 %v588_v43 }
 0x2e9   :  { %v907_v44 = vpop.eup %906 }
 0x2ea   :  { %v591_v45 = vrot.slane %v907_v44, 6  ;;  %v594_v47 = vrot.slane %v907_v44, 7 }
 0x2ec   :  { %v593_v46 = vmul.f32 %v591_v45, %v587_v42 }
 0x2ee   :  { %v596_v48 = vmul.f32 %v594_v47, %v593_v46 }
 0x2f0   :  { %v597_v49 = vsub.f32 1.0, %v596_v48 }
 0x2f2   :  { %600 = vperm.xlu0 %904, %v597_v49  }
 0x371   :  { %v601_v50 = vpop.permute.xlu0 %600 }
 0x372   :  { %603 = vst [vmem:[#allocation5 - $0x2] sm:$0x4] %v601_v50 }
 0x373   :  { %941 = shalt.err (!%p938_p12)
}
 0x374   :  { %s942_s10 = scalar_lea.hbm %s1052_s3, 16 }
 0x375   :  { %p943_p13 = scmp.ne.s32.totalorder %s1052_s3, %s942_s10  ;;  %p946_p0 = scmp.lt.u32.totalorder %s942_s10, %s1052_s3 }
 0x377   :  { %p948_p1 = pnand %p946_p0, %p943_p13 }
 0x379   :  { %951 = shalt.err (!%p948_p1)
}
 0x37a   :  { %613 = dma.vmem_to_hbm [thread:$0]  %s611_s5, 16, %s1052_s3, [#allocation4]  }
 0x37b   :  { %954 = dma.done.wait [#allocation4], 16  }
 0x37c   :  { %955 = vsyncadd [#allocation4], 4294967280 }
 0x37d   :  { %617 = vsyncpa [#allocation3], 1 }
 0x37e   :  { %618 = vsyncpa [#allocation4], 1 }

</bundles_post_ra>
